<compile_context>
chip_gen: v7x
topology: tpu7x:2x2x1
jax: 0.10.0
libtpu: 0.0.40
codegen_flags: <defaults>
</compile_context>

<pallas_src>
import functools
import math

import jax
import jax.numpy as jnp
from jax.experimental import pallas as pl
from jax.experimental.pallas import tpu as pltpu

_LANE = 128      # lane width: output feature dims are pre-padded to this
_TM_CAP = 256    # max rows per grid step (tiny calls -> a single grid step)


def _round_up(a, m):
    return ((a + m - 1) // m) * m


# ----------------------------------------------------------------------------
# In-kernel exact GELU.  erf via Abramowitz & Stegun 7.1.26 (|err| <= 1.5e-7):
# uses only abs/mul/add/div/exp/where, so it lowers in Mosaic and the exp
# lands on the EUP slot (overlaps the second FFN matmul's MXU work).
# ----------------------------------------------------------------------------
_SQRT1_2 = 0.7071067811865476


def _erf_approx(x):
    p = 0.3275911
    a1, a2, a3, a4, a5 = (0.254829592, -0.284496736, 1.421413741,
                          -1.453152027, 1.061405429)
    ax = jnp.abs(x)
    t = 1.0 / (1.0 + p * ax)
    poly = ((((a5 * t + a4) * t + a3) * t + a2) * t + a1) * t
    y = 1.0 - poly * jnp.exp(-ax * ax)
    return jnp.where(x >= 0.0, y, -y)


def _gelu_exact(x):
    return 0.5 * x * (1.0 + _erf_approx(x * _SQRT1_2))


# ----------------------------------------------------------------------------
# Pallas kernels
# ----------------------------------------------------------------------------
def _linear_bias_kernel(x_ref, w_ref, b_ref, o_ref):
    # x: (tm, K) bf16 | w: (K, Np) bf16 (resident) | b: (1, Np) f32 | o: (tm, Np) f32
    o_ref[...] = (
        jnp.dot(x_ref[...], w_ref[...], preferred_element_type=jnp.float32)
        + b_ref[...]
    )


def _ffn_kernel(x_ref, w1_ref, b1_ref, w2_ref, b2_ref, o_ref):
    # Fused ff1 -> exact GELU -> ff2; the (tm, d_ff) hidden stays in VMEM/vregs.
    h = (jnp.dot(x_ref[...], w1_ref[...], preferred_element_type=jnp.float32)
         + b1_ref[...])
    h = _gelu_exact(h)
    o_ref[...] = (
        jnp.dot(h.astype(w2_ref.dtype), w2_ref[...],
                preferred_element_type=jnp.float32)
        + b2_ref[...]
    )


# ----------------------------------------------------------------------------
# Kernel wrappers (weights arrive already padded / bf16-cast from prepare_params)
# ----------------------------------------------------------------------------
def _row_tiles(m_rows):
    tm = min(_TM_CAP, _round_up(m_rows, 8))
    return tm, _round_up(m_rows, tm)


def pallas_linear(x2d, w_pad, b_pad, n_out):
    """y = x2d @ W + b.  w_pad: (K, Np) bf16 with Np % 128 == 0 (pre-padded),
    b_pad: (1, Np) f32.  Returns (M, n_out) f32."""
    M, K = x2d.shape
    Kw, Np = w_pad.shape
    assert K == Kw and Np % _LANE == 0
    tm, m_pad = _row_tiles(M)
    x = x2d.astype(jnp.bfloat16)
    if m_pad != M:
        x = jnp.pad(x, ((0, m_pad - M), (0, 0)))
    out = pl.pallas_call(
        _linear_bias_kernel,
        out_shape=jax.ShapeDtypeStruct((m_pad, Np), jnp.float32),
        grid=(m_pad // tm,),
        in_specs=[
            pl.BlockSpec((tm, K), lambda i: (i, 0)),    # row tile of x
            # Weights/bias have a constant block index (resident).  With the
            # single grid step used here there is nothing to double-buffer;
            # for genuinely multi-step/large-M cases these two specs could add
            # pipeline_mode=pl.Buffered(1) to drop the redundant second buffer.
            pl.BlockSpec((K, Np), lambda i: (0, 0)),
            pl.BlockSpec((1, Np), lambda i: (0, 0)),
        ],
        out_specs=pl.BlockSpec((tm, Np), lambda i: (i, 0)),
        compiler_params=pltpu.CompilerParams(
            dimension_semantics=("arbitrary",)),
    )(x, w_pad, b_pad)
    return out[:M, :n_out]


def pallas_ffn(x2d, ff, n_out):
    """Fused (x @ W1 + b1) -> exact GELU -> (@ W2 + b2).  Returns (M, n_out) f32."""
    M, K = x2d.shape
    d_ffp = ff["w1"].shape[1]
    Np = ff["w2"].shape[1]
    tm, m_pad = _row_tiles(M)
    x = x2d.astype(jnp.bfloat16)
    if m_pad != M:
        x = jnp.pad(x, ((0, m_pad - M), (0, 0)))
    out = pl.pallas_call(
        _ffn_kernel,
        out_shape=jax.ShapeDtypeStruct((m_pad, Np), jnp.float32),
        grid=(m_pad // tm,),
        in_specs=[
            pl.BlockSpec((tm, K), lambda i: (i, 0)),
            pl.BlockSpec((K, d_ffp), lambda i: (0, 0)),
            pl.BlockSpec((1, d_ffp), lambda i: (0, 0)),
            pl.BlockSpec((d_ffp, Np), lambda i: (0, 0)),
            pl.BlockSpec((1, Np), lambda i: (0, 0)),
        ],
        out_specs=pl.BlockSpec((tm, Np), lambda i: (i, 0)),
        compiler_params=pltpu.CompilerParams(
            dimension_semantics=("arbitrary",)),
    )(x, ff["w1"], ff["b1"], ff["w2"], ff["b2"])
    return out[:M, :n_out]


# ----------------------------------------------------------------------------
# Model forward (Pallas kernels + thin JAX glue)
# ----------------------------------------------------------------------------
def layer_norm(x, gamma, beta, eps=1e-5):
    mu = jnp.mean(x, axis=-1, keepdims=True)
    var = jnp.mean(jnp.square(x - mu), axis=-1, keepdims=True)
    return (x - mu) * jax.lax.rsqrt(var + eps) * gamma + beta


def position_timing_forward(p, x, d_model):
    # The positional/timing input is batch-invariant -> run the integration
    # linear once on [S, D] and broadcast the result over the batch.
    B, S, D = x.shape
    pt = jnp.concatenate([p["pos_emb"][:S], p["time_emb"][:S]], axis=-1)  # [S, D]
    delta = pallas_linear(pt, p["integration"]["w"], p["integration"]["b"], d_model)
    return x + delta[None]


def mechanism_attention_forward(p, x, n_heads, d_model):
    B, S, D = x.shape
    dh = D // n_heads
    dm2 = D // 2
    x2 = x.reshape(B * S, D)

    # Fused wide projection: [Q | K | V | mech1]  (N = 3D + D/2 = 224 -> 256 lanes).
    qkvm = pallas_linear(x2, p["qkvm"]["w"], p["qkvm"]["b"], 3 * D + dm2)

    def heads(t):
        return t.reshape(B, S, n_heads, dh).transpose(0, 2, 1, 3)

    q = heads(qkvm[:, :D])
    k = heads(qkvm[:, D:2 * D])
    v = heads(qkvm[:, 2 * D:3 * D])

    # Mechanism MLP tail (32 -> 1): matvec-sized, plain JAX (no pallas dispatch).
    h = jax.nn.gelu(qkvm[:, 3 * D:3 * D + dm2], approximate=False)
    mech = jax.nn.sigmoid(h @ p["mech2_w"] + p["mech2_b"]).reshape(B, S)

    # TODO(synk): score/softmax/context is XLA glue; for long sequences this
    # stage would become a fused flash-attention style Pallas kernel.
    scores = jnp.einsum("bhqd,bhkd->bhqk", q, k) / math.sqrt(dh)
    scores = scores * (1.0 + mech[:, None, None, :])
    attn = jax.nn.softmax(scores, axis=-1)
    ctx = jnp.einsum("bhqk,bhkd->bhqd", attn, v)
    ctx = ctx.transpose(0, 2, 1, 3).reshape(B * S, D)

    out = pallas_linear(ctx, p["out"]["w"], p["out"]["b"], d_model).reshape(B, S, D)
    return out, mech


def transformer_block_forward(p, x, n_heads, d_model):
    B, S, D = x.shape
    x = position_timing_forward(p["pos_time"], x, d_model)

    attn_out, mech = mechanism_attention_forward(
        p, layer_norm(x, *p["norm1"]), n_heads, d_model)
    x = x + attn_out                                   # dropout = identity (eval)

    # Five-elements layer: the softmax over element_weights is folded into ONE
    # combined weight/bias at prepare_params() time (exact: the op is linear
    # in W and b), so this is a single matmul.
    xn = layer_norm(x, *p["norm2"]).reshape(B * S, D)
    x = x + pallas_linear(xn, p["five"]["w"], p["five"]["b"],
                          d_model).reshape(B, S, D)

    # Fused ff1 -> GELU -> ff2 (hidden activation never round-trips to HBM).
    xn = layer_norm(x, *p["norm3"]).reshape(B * S, D)
    x = x + pallas_ffn(xn, p["ff"], d_model).reshape(B, S, D)
    return x, mech


def trigger_mechanism_forward(prepped, tokens, *, n_heads, d_model):
    x = prepped["token_emb"][tokens]                   # [B, S, D] gather (glue)
    B, S, D = x.shape
    x = pallas_linear(x.reshape(B * S, D), prepped["embedding"]["w"],
                      prepped["embedding"]["b"], d_model).reshape(B, S, D)
    mech_all = []
    # TODO(synk): a whole block (layernorms + attention + five-elements + FFN)
    # is small enough to fuse into one pallas_call with activations resident in
    # VMEM; kept as per-stage kernels + XLA glue here.
    for blk in prepped["blocks"]:
        x, mech = transformer_block_forward(blk, x, n_heads, d_model)
        mech_all.append(mech)
    x = layer_norm(x, *prepped["norm"])
    x = jnp.mean(x, axis=1)                            # [B, D]
    out = (x @ prepped["fc_w"] + prepped["fc_b"]).squeeze(-1)   # N=1 head: plain JAX
    return out, mech_all


# ----------------------------------------------------------------------------
# Parameter initialization (deterministic JAX re-implementation of the inits)
# ----------------------------------------------------------------------------
def _linear_params(key, d_in, d_out):
    kw, kb = jax.random.split(key)
    bound = 1.0 / math.sqrt(d_in)
    return {"w": jax.random.uniform(kw, (d_in, d_out), jnp.float32, -bound, bound),
            "b": jax.random.uniform(kb, (d_out,), jnp.float32, -bound, bound)}


def _sinusoid_embedding(max_len, dim, base):
    pos = jnp.arange(max_len, dtype=jnp.float32)[:, None]
    div = jnp.exp(jnp.arange(0, dim, 2, dtype=jnp.float32) * (-math.log(base) / dim))
    ang = pos * div
    emb = jnp.zeros((max_len, dim), jnp.float32)
    emb = emb.at[:, 0::2].set(jnp.sin(ang))
    emb = emb.at[:, 1::2].set(jnp.cos(ang))
    return emb


def _init_five_elements(key, d):
    k_fire, k_metal, k_bias = jax.random.split(key, 3)
    eye = jnp.eye(d, dtype=jnp.float32)
    wood = eye * 1.2
    fire = eye + jax.random.normal(k_fire, (d, d), jnp.float32) * 0.1
    earth = eye * 0.8
    metal = eye * (jax.random.uniform(k_metal, (d, d)) > 0.7).astype(jnp.float32)
    dist = jnp.abs(jnp.arange(d)[:, None] - jnp.arange(d)[None, :])
    water = jnp.where(dist <= 1, 1.0 / (dist + 1.0), 0.0).astype(jnp.float32)
    w_stack = jnp.stack([wood, fire, earth, metal, water], axis=0)  # [5, d_in, d_out]
    bound = 1.0 / math.sqrt(d)
    b_stack = jax.random.uniform(k_bias, (5, d), jnp.float32, -bound, bound)
    return {"w_stack": w_stack, "b_stack": b_stack,
            "element_weights": jnp.ones((5,), jnp.float32) / 5.0}


def init_model_params(key, vocab_size, d_model, n_heads, n_layers, d_ff,
                      max_seq_len=128):
    keys = jax.random.split(key, 3 + n_layers)
    dm2 = d_model // 2
    params = {
        "token_emb": jax.random.normal(keys[0], (vocab_size, d_model), jnp.float32),
        "embedding": _linear_params(keys[1], d_model, d_model),
        "fc": _linear_params(keys[2], d_model, 1),
        "norm": (jnp.ones(d_model, jnp.float32), jnp.zeros(d_model, jnp.float32)),
        "blocks": [],
    }
    for l in range(n_layers):
        bkeys = jax.random.split(keys[3 + l], 10)
        blk = {
            "pos_time": {
                "pos_emb": _sinusoid_embedding(max_seq_len, dm2, 10000.0),
                "time_emb": _sinusoid_embedding(max_seq_len, dm2, 5000.0),
                "integration": _linear_params(bkeys[0], d_model, d_model),
            },
            "attn": {
                "q": _linear_params(bkeys[1], d_model, d_model),
                "k": _linear_params(bkeys[2], d_model, d_model),
                "v": _linear_params(bkeys[3], d_model, d_model),
                "out": _linear_params(bkeys[4], d_model, d_model),
                "mech1": _linear_params(bkeys[5], d_model, dm2),
                "mech2": _linear_params(bkeys[6], dm2, 1),
            },
            "five": _init_five_elements(bkeys[7], d_model),
            "ff1": _linear_params(bkeys[8], d_model, d_ff),
            "ff2": _linear_params(bkeys[9], d_ff, d_model),
            "norm1": (jnp.ones(d_model, jnp.float32), jnp.zeros(d_model, jnp.float32)),
            "norm2": (jnp.ones(d_model, jnp.float32), jnp.zeros(d_model, jnp.float32)),
            "norm3": (jnp.ones(d_model, jnp.float32), jnp.zeros(d_model, jnp.float32)),
        }
        params["blocks"].append(blk)
    return params


# ----------------------------------------------------------------------------
# One-time weight preparation (hoisted out of the jitted forward path)
# ----------------------------------------------------------------------------
def _prep_linear(w, b):
    K, N = w.shape
    Np = _round_up(N, _LANE)
    return {"w": jnp.pad(w, ((0, 0), (0, Np - N))).astype(jnp.bfloat16),
            "b": jnp.pad(b, (0, Np - N)).astype(jnp.float32).reshape(1, Np)}


def prepare_params(params):
    prepped = {
        "token_emb": params["token_emb"],
        "embedding": _prep_linear(params["embedding"]["w"], params["embedding"]["b"]),
        "fc_w": params["fc"]["w"], "fc_b": params["fc"]["b"],
        "norm": params["norm"],
        "blocks": [],
    }
    for blk in params["blocks"]:
        attn = blk["attn"]
        # Fused [Q | K | V | mech1] weight, padded to 256 lanes.
        qkvm_w = jnp.concatenate(
            [attn["q"]["w"], attn["k"]["w"], attn["v"]["w"], attn["mech1"]["w"]], axis=1)
        qkvm_b = jnp.concatenate(
            [attn["q"]["b"], attn["k"]["b"], attn["v"]["b"], attn["mech1"]["b"]])
        # Five-elements: fold the softmax over element_weights into one weight/bias.
        five = blk["five"]
        ew = jax.nn.softmax(five["element_weights"])
        w_comb = jnp.einsum("k,kio->io", ew, five["w_stack"])
        b_comb = ew @ five["b_stack"]
        # FFN: pad d_ff (hidden) and d_model (out).  Zero hidden columns give
        # GELU(0) = 0, so the padding is exact.
        d_ff = blk["ff1"]["w"].shape[1]
        d_ffp = _round_up(d_ff, _LANE)
        ff1 = _prep_linear(blk["ff1"]["w"], blk["ff1"]["b"])
        ff2 = _prep_linear(jnp.pad(blk["ff2"]["w"], ((0, d_ffp - d_ff), (0, 0))),
                           blk["ff2"]["b"])
        prepped["blocks"].append({
            "pos_time": {
                "pos_emb": blk["pos_time"]["pos_emb"],
                "time_emb": blk["pos_time"]["time_emb"],
                "integration": _prep_linear(blk["pos_time"]["integration"]["w"],
                                            blk["pos_time"]["integration"]["b"]),
            },
            "qkvm": _prep_linear(qkvm_w, qkvm_b),
            "mech2_w": attn["mech2"]["w"], "mech2_b": attn["mech2"]["b"],
            "out": _prep_linear(attn["out"]["w"], attn["out"]["b"]),
            "five": _prep_linear(w_comb, b_comb),
            "ff": {"w1": ff1["w"], "b1": ff1["b"], "w2": ff2["w"], "b2": ff2["b"]},
            "norm1": blk["norm1"], "norm2": blk["norm2"], "norm3": blk["norm3"],
        })
    return prepped


# ----------------------------------------------------------------------------
# Pure-JAX f32 reference (faithful, un-fused re-implementation of the module)
# ----------------------------------------------------------------------------
def reference_forward(params, tokens, n_heads):
    def linear(p, x):
        return x @ p["w"] + p["b"]

    x = params["token_emb"][tokens]
    x = linear(params["embedding"], x)
    mech_all = []
    for blk in params["blocks"]:
        B, S, D = x.shape
        dh = D // n_heads
        ptp = blk["pos_time"]
        pt = jnp.concatenate([ptp["pos_emb"][:S], ptp["time_emb"][:S]], axis=-1)
        pt = jnp.broadcast_to(pt[None], (B, S, D))
        x = x + linear(ptp["integration"], pt)

        xn = layer_norm(x, *blk["norm1"])
        a = blk["attn"]

        def heads(t):
            return t.reshape(B, S, n_heads, dh).transpose(0, 2, 1, 3)

        q, k, v = (heads(linear(a["q"], xn)), heads(linear(a["k"], xn)),
                   heads(linear(a["v"], xn)))
        hmid = jax.nn.gelu(linear(a["mech1"], xn), approximate=False)
        mech = jax.nn.sigmoid(linear(a["mech2"], hmid)).squeeze(-1)
        scores = jnp.einsum("bhqd,bhkd->bhqk", q, k) / math.sqrt(dh)
        scores = scores * (1.0 + mech[:, None, None, :])
        attn = jax.nn.softmax(scores, axis=-1)
        ctx = jnp.einsum("bhqk,bhkd->bhqd", attn, v)
        ctx = ctx.transpose(0, 2, 1, 3).reshape(B, S, D)
        x = x + linear(a["out"], ctx)

        xn = layer_norm(x, *blk["norm2"])
        five = blk["five"]
        ew = jax.nn.softmax(five["element_weights"])
        projs = (jnp.einsum("bsi,kio->kbso", xn, five["w_stack"])
                 + five["b_stack"][:, None, None, :])
        x = x + jnp.einsum("k,kbso->bso", ew, projs)

        xn = layer_norm(x, *blk["norm3"])
        h = jax.nn.gelu(linear(blk["ff1"], xn), approximate=False)
        x = x + linear(blk["ff2"], h)
        mech_all.append(mech)
    x = layer_norm(x, *params["norm"])
    x = jnp.mean(x, axis=1)
    out = linear(params["fc"], x).squeeze(-1)
    return out, mech_all


# ----------------------------------------------------------------------------
if __name__ == "__main__":
    VOCAB, D_MODEL, N_HEADS, N_LAYERS, D_FF = 50, 64, 4, 2, 128
    B, S = 4, 20   # small batch; seq_len consistent with the module

    key = jax.random.PRNGKey(0)
    k_tok, k_param = jax.random.split(key)
    tokens = jax.random.randint(k_tok, (B, S), 0, VOCAB)
    params = init_model_params(k_param, VOCAB, D_MODEL, N_HEADS, N_LAYERS, D_FF)

    prepped = prepare_params(params)   # one-time weight prep (outside jit)

    fwd = jax.jit(functools.partial(trigger_mechanism_forward,
                                    n_heads=N_HEADS, d_model=D_MODEL))
    out_p, mech_p = fwd(prepped, tokens)
    out_p = jax.block_until_ready(out_p)

    out_r, mech_r = reference_forward(params, tokens, N_HEADS)

    assert out_p.shape == (B,)
    mp, mr = jnp.stack(mech_p), jnp.stack(mech_r)
    assert mp.shape == (N_LAYERS, B, S)
    # bf16 matmul inputs with f32 accumulation => relaxed tolerances.
    assert jnp.allclose(out_p, out_r, atol=5e-2, rtol=5e-2), (out_p, out_r)
    assert jnp.allclose(mp, mr, atol=2e-2, rtol=2e-2)

    print("KERNEL_OK")
</pallas_src>

<mosaic_0001>
module attributes {stable_mosaic.version = 11 : i64} {
  func.func @_linear_bias_kernel(%arg0: i32, %arg1: memref<24x64xbf16, #tpu.memory_space<vmem>>, %arg2: memref<64x128xbf16, #tpu.memory_space<vmem>>, %arg3: memref<1x128xf32, #tpu.memory_space<vmem>>, %arg4: memref<24x128xf32, #tpu.memory_space<vmem>>) attributes {dimension_semantics = [#tpu.dimension_semantics<arbitrary>], iteration_bounds = array<i64: 1>, scalar_prefetch = 0 : i64, scratch_operands = 0 : i64, tpu.core_type = #tpu.core_type<tc>, window_params = [{transform_indices = @transform_0, window_bounds = array<i64: 24, 64>}, {pipeline_mode = #tpu.pipeline_mode<synchronous>, transform_indices = @transform_1, window_bounds = array<i64: 64, 128>}, {pipeline_mode = #tpu.pipeline_mode<synchronous>, transform_indices = @transform_2, window_bounds = array<i64: 1, 128>}, {transform_indices = @transform_3, window_bounds = array<i64: 24, 128>}]} {
    %c0 = arith.constant 0 : index
    %c0_0 = arith.constant 0 : index
    %0 = vector.load %arg1[%c0, %c0_0] : memref<24x64xbf16, #tpu.memory_space<vmem>>, vector<24x64xbf16>
    %c0_1 = arith.constant 0 : index
    %c0_2 = arith.constant 0 : index
    %1 = vector.load %arg2[%c0_1, %c0_2] : memref<64x128xbf16, #tpu.memory_space<vmem>>, vector<64x128xbf16>
    %cst = arith.constant dense<0.000000e+00> : vector<24x128xf32>
    %2 = tpu.matmul %0, %1, %cst {dimension_numbers = #tpu.dot_dimension_numbers<[1], [0], [0], [1], [0, 0, 1, 1], [], []>} : vector<24x64xbf16>, vector<64x128xbf16>, vector<24x128xf32> -> vector<24x128xf32>
    %c0_3 = arith.constant 0 : index
    %c0_4 = arith.constant 0 : index
    %3 = vector.load %arg3[%c0_3, %c0_4] : memref<1x128xf32, #tpu.memory_space<vmem>>, vector<1x128xf32>
    %4 = vector.broadcast %3 : vector<1x128xf32> to vector<24x128xf32>
    %5 = arith.addf %2, %4 : vector<24x128xf32>
    %c0_5 = arith.constant 0 : index
    %c0_6 = arith.constant 0 : index
    %6 = vector.load %arg4[%c0_5, %c0_6] : memref<24x128xf32, #tpu.memory_space<vmem>>, vector<24x128xf32>
    tpu.vector_store %arg4[%c0_5, %c0_6], %5 {strides = array<i32>} : memref<24x128xf32, #tpu.memory_space<vmem>>, vector<24x128xf32>,
    return
  }
  func.func @transform_0(%arg0: i32) -> (i32, i32) {
    %c0_i32 = arith.constant 0 : i32
    %c0_i32_0 = arith.constant 0 : i32
    return %arg0, %c0_i32 : i32, i32
  }
  func.func @transform_1(%arg0: i32) -> (i32, i32) {
    %c0_i32 = arith.constant 0 : i32
    %c0_i32_0 = arith.constant 0 : i32
    %c0_i32_1 = arith.constant 0 : i32
    return %c0_i32, %c0_i32_0 : i32, i32
  }
  func.func @transform_2(%arg0: i32) -> (i32, i32) {
    %c0_i32 = arith.constant 0 : i32
    %c0_i32_0 = arith.constant 0 : i32
    %c0_i32_1 = arith.constant 0 : i32
    return %c0_i32, %c0_i32_0 : i32, i32
  }
  func.func @transform_3(%arg0: i32) -> (i32, i32) {
    %c0_i32 = arith.constant 0 : i32
    %c0_i32_0 = arith.constant 0 : i32
    return %arg0, %c0_i32 : i32, i32
  }
}

module attributes {stable_mosaic.version = 11 : i64} {
  func.func @_linear_bias_kernel(%arg0: i32, %arg1: memref<80x64xbf16, #tpu.memory_space<vmem>>, %arg2: memref<64x128xbf16, #tpu.memory_space<vmem>>, %arg3: memref<1x128xf32, #tpu.memory_space<vmem>>, %arg4: memref<80x128xf32, #tpu.memory_space<vmem>>) attributes {dimension_semantics = [#tpu.dimension_semantics<arbitrary>], iteration_bounds = array<i64: 1>, scalar_prefetch = 0 : i64, scratch_operands = 0 : i64, tpu.core_type = #tpu.core_type<tc>, window_params = [{transform_indices = @transform_0, window_bounds = array<i64: 80, 64>}, {pipeline_mode = #tpu.pipeline_mode<synchronous>, transform_indices = @transform_1, window_bounds = array<i64: 64, 128>}, {pipeline_mode = #tpu.pipeline_mode<synchronous>, transform_indices = @transform_2, window_bounds = array<i64: 1, 128>}, {transform_indices = @transform_3, window_bounds = array<i64: 80, 128>}]} {
    %c0 = arith.constant 0 : index
    %c0_0 = arith.constant 0 : index
    %0 = vector.load %arg1[%c0, %c0_0] : memref<80x64xbf16, #tpu.memory_space<vmem>>, vector<80x64xbf16>
    %c0_1 = arith.constant 0 : index
    %c0_2 = arith.constant 0 : index
    %1 = vector.load %arg2[%c0_1, %c0_2] : memref<64x128xbf16, #tpu.memory_space<vmem>>, vector<64x128xbf16>
    %cst = arith.constant dense<0.000000e+00> : vector<80x128xf32>
    %2 = tpu.matmul %0, %1, %cst {dimension_numbers = #tpu.dot_dimension_numbers<[1], [0], [0], [1], [0, 0, 1, 1], [], []>} : vector<80x64xbf16>, vector<64x128xbf16>, vector<80x128xf32> -> vector<80x128xf32>
    %c0_3 = arith.constant 0 : index
    %c0_4 = arith.constant 0 : index
    %3 = vector.load %arg3[%c0_3, %c0_4] : memref<1x128xf32, #tpu.memory_space<vmem>>, vector<1x128xf32>
    %4 = vector.broadcast %3 : vector<1x128xf32> to vector<80x128xf32>
    %5 = arith.addf %2, %4 : vector<80x128xf32>
    %c0_5 = arith.constant 0 : index
    %c0_6 = arith.constant 0 : index
    %6 = vector.load %arg4[%c0_5, %c0_6] : memref<80x128xf32, #tpu.memory_space<vmem>>, vector<80x128xf32>
    tpu.vector_store %arg4[%c0_5, %c0_6], %5 {strides = array<i32>} : memref<80x128xf32, #tpu.memory_space<vmem>>, vector<80x128xf32>,
    return
  }
  func.func @transform_0(%arg0: i32) -> (i32, i32) {
    %c0_i32 = arith.constant 0 : i32
    %c0_i32_0 = arith.constant 0 : i32
    return %arg0, %c0_i32 : i32, i32
  }
  func.func @transform_1(%arg0: i32) -> (i32, i32) {
    %c0_i32 = arith.constant 0 : i32
    %c0_i32_0 = arith.constant 0 : i32
    %c0_i32_1 = arith.constant 0 : i32
    return %c0_i32, %c0_i32_0 : i32, i32
  }
  func.func @transform_2(%arg0: i32) -> (i32, i32) {
    %c0_i32 = arith.constant 0 : i32
    %c0_i32_0 = arith.constant 0 : i32
    %c0_i32_1 = arith.constant 0 : i32
    return %c0_i32, %c0_i32_0 : i32, i32
  }
  func.func @transform_3(%arg0: i32) -> (i32, i32) {
    %c0_i32 = arith.constant 0 : i32
    %c0_i32_0 = arith.constant 0 : i32
    return %arg0, %c0_i32 : i32, i32
  }
}

module attributes {stable_mosaic.version = 11 : i64} {
  func.func @_linear_bias_kernel(%arg0: i32, %arg1: memref<80x64xbf16, #tpu.memory_space<vmem>>, %arg2: memref<64x256xbf16, #tpu.memory_space<vmem>>, %arg3: memref<1x256xf32, #tpu.memory_space<vmem>>, %arg4: memref<80x256xf32, #tpu.memory_space<vmem>>) attributes {dimension_semantics = [#tpu.dimension_semantics<arbitrary>], iteration_bounds = array<i64: 1>, scalar_prefetch = 0 : i64, scratch_operands = 0 : i64, tpu.core_type = #tpu.core_type<tc>, window_params = [{transform_indices = @transform_0, window_bounds = array<i64: 80, 64>}, {pipeline_mode = #tpu.pipeline_mode<synchronous>, transform_indices = @transform_1, window_bounds = array<i64: 64, 256>}, {pipeline_mode = #tpu.pipeline_mode<synchronous>, transform_indices = @transform_2, window_bounds = array<i64: 1, 256>}, {transform_indices = @transform_3, window_bounds = array<i64: 80, 256>}]} {
    %c0 = arith.constant 0 : index
    %c0_0 = arith.constant 0 : index
    %0 = vector.load %arg1[%c0, %c0_0] : memref<80x64xbf16, #tpu.memory_space<vmem>>, vector<80x64xbf16>
    %c0_1 = arith.constant 0 : index
    %c0_2 = arith.constant 0 : index
    %1 = vector.load %arg2[%c0_1, %c0_2] : memref<64x256xbf16, #tpu.memory_space<vmem>>, vector<64x256xbf16>
    %cst = arith.constant dense<0.000000e+00> : vector<80x256xf32>
    %2 = tpu.matmul %0, %1, %cst {dimension_numbers = #tpu.dot_dimension_numbers<[1], [0], [0], [1], [0, 0, 1, 1], [], []>} : vector<80x64xbf16>, vector<64x256xbf16>, vector<80x256xf32> -> vector<80x256xf32>
    %c0_3 = arith.constant 0 : index
    %c0_4 = arith.constant 0 : index
    %3 = vector.load %arg3[%c0_3, %c0_4] : memref<1x256xf32, #tpu.memory_space<vmem>>, vector<1x256xf32>
    %4 = vector.broadcast %3 : vector<1x256xf32> to vector<80x256xf32>
    %5 = arith.addf %2, %4 : vector<80x256xf32>
    %c0_5 = arith.constant 0 : index
    %c0_6 = arith.constant 0 : index
    %6 = vector.load %arg4[%c0_5, %c0_6] : memref<80x256xf32, #tpu.memory_space<vmem>>, vector<80x256xf32>
    tpu.vector_store %arg4[%c0_5, %c0_6], %5 {strides = array<i32>} : memref<80x256xf32, #tpu.memory_space<vmem>>, vector<80x256xf32>,
    return
  }
  func.func @transform_0(%arg0: i32) -> (i32, i32) {
    %c0_i32 = arith.constant 0 : i32
    %c0_i32_0 = arith.constant 0 : i32
    return %arg0, %c0_i32 : i32, i32
  }
  func.func @transform_1(%arg0: i32) -> (i32, i32) {
    %c0_i32 = arith.constant 0 : i32
    %c0_i32_0 = arith.constant 0 : i32
    %c0_i32_1 = arith.constant 0 : i32
    return %c0_i32, %c0_i32_0 : i32, i32
  }
  func.func @transform_2(%arg0: i32) -> (i32, i32) {
    %c0_i32 = arith.constant 0 : i32
    %c0_i32_0 = arith.constant 0 : i32
    %c0_i32_1 = arith.constant 0 : i32
    return %c0_i32, %c0_i32_0 : i32, i32
  }
  func.func @transform_3(%arg0: i32) -> (i32, i32) {
    %c0_i32 = arith.constant 0 : i32
    %c0_i32_0 = arith.constant 0 : i32
    return %arg0, %c0_i32 : i32, i32
  }
}

module attributes {stable_mosaic.version = 11 : i64} {
  func.func @_ffn_kernel(%arg0: i32, %arg1: memref<80x64xbf16, #tpu.memory_space<vmem>>, %arg2: memref<64x128xbf16, #tpu.memory_space<vmem>>, %arg3: memref<1x128xf32, #tpu.memory_space<vmem>>, %arg4: memref<128x128xbf16, #tpu.memory_space<vmem>>, %arg5: memref<1x128xf32, #tpu.memory_space<vmem>>, %arg6: memref<80x128xf32, #tpu.memory_space<vmem>>) attributes {dimension_semantics = [#tpu.dimension_semantics<arbitrary>], iteration_bounds = array<i64: 1>, scalar_prefetch = 0 : i64, scratch_operands = 0 : i64, tpu.core_type = #tpu.core_type<tc>, window_params = [{transform_indices = @transform_0, window_bounds = array<i64: 80, 64>}, {pipeline_mode = #tpu.pipeline_mode<synchronous>, transform_indices = @transform_1, window_bounds = array<i64: 64, 128>}, {pipeline_mode = #tpu.pipeline_mode<synchronous>, transform_indices = @transform_2, window_bounds = array<i64: 1, 128>}, {pipeline_mode = #tpu.pipeline_mode<synchronous>, transform_indices = @transform_3, window_bounds = array<i64: 128, 128>}, {pipeline_mode = #tpu.pipeline_mode<synchronous>, transform_indices = @transform_4, window_bounds = array<i64: 1, 128>}, {transform_indices = @transform_5, window_bounds = array<i64: 80, 128>}]} {
    %c0 = arith.constant 0 : index
    %c0_0 = arith.constant 0 : index
    %0 = vector.load %arg1[%c0, %c0_0] : memref<80x64xbf16, #tpu.memory_space<vmem>>, vector<80x64xbf16>
    %c0_1 = arith.constant 0 : index
    %c0_2 = arith.constant 0 : index
    %1 = vector.load %arg2[%c0_1, %c0_2] : memref<64x128xbf16, #tpu.memory_space<vmem>>, vector<64x128xbf16>
    %cst = arith.constant dense<0.000000e+00> : vector<80x128xf32>
    %2 = tpu.matmul %0, %1, %cst {dimension_numbers = #tpu.dot_dimension_numbers<[1], [0], [0], [1], [0, 0, 1, 1], [], []>} : vector<80x64xbf16>, vector<64x128xbf16>, vector<80x128xf32> -> vector<80x128xf32>
    %c0_3 = arith.constant 0 : index
    %c0_4 = arith.constant 0 : index
    %3 = vector.load %arg3[%c0_3, %c0_4] : memref<1x128xf32, #tpu.memory_space<vmem>>, vector<1x128xf32>
    %4 = vector.broadcast %3 : vector<1x128xf32> to vector<80x128xf32>
    %5 = arith.addf %2, %4 : vector<80x128xf32>
    %cst_5 = arith.constant 5.000000e-01 : f32
    %6 = vector.broadcast %cst_5 : f32 to vector<80x128xf32>
    %7 = arith.mulf %6, %5 : vector<80x128xf32>
    %cst_6 = arith.constant 0.707106769 : f32
    %8 = vector.broadcast %cst_6 : f32 to vector<80x128xf32>
    %9 = arith.mulf %5, %8 : vector<80x128xf32>
    %10 = math.absf %9 : vector<80x128xf32>
    %cst_7 = arith.constant 0.327591091 : f32
    %11 = vector.broadcast %cst_7 : f32 to vector<80x128xf32>
    %12 = arith.mulf %11, %10 : vector<80x128xf32>
    %cst_8 = arith.constant 1.000000e+00 : f32
    %13 = vector.broadcast %cst_8 : f32 to vector<80x128xf32>
    %14 = arith.addf %13, %12 : vector<80x128xf32>
    %cst_9 = arith.constant 1.000000e+00 : f32
    %15 = vector.broadcast %cst_9 : f32 to vector<80x128xf32>
    %16 = arith.divf %15, %14 : vector<80x128xf32>
    %cst_10 = arith.constant 1.06140542 : f32
    %17 = vector.broadcast %cst_10 : f32 to vector<80x128xf32>
    %18 = arith.mulf %17, %16 : vector<80x128xf32>
    %cst_11 = arith.constant -1.45315206 : f32
    %19 = vector.broadcast %cst_11 : f32 to vector<80x128xf32>
    %20 = arith.addf %18, %19 : vector<80x128xf32>
    %21 = arith.mulf %20, %16 : vector<80x128xf32>
    %cst_12 = arith.constant 1.42141378 : f32
    %22 = vector.broadcast %cst_12 : f32 to vector<80x128xf32>
    %23 = arith.addf %21, %22 : vector<80x128xf32>
    %24 = arith.mulf %23, %16 : vector<80x128xf32>
    %cst_13 = arith.constant -0.284496725 : f32
    %25 = vector.broadcast %cst_13 : f32 to vector<80x128xf32>
    %26 = arith.addf %24, %25 : vector<80x128xf32>
    %27 = arith.mulf %26, %16 : vector<80x128xf32>
    %cst_14 = arith.constant 0.254829586 : f32
    %28 = vector.broadcast %cst_14 : f32 to vector<80x128xf32>
    %29 = arith.addf %27, %28 : vector<80x128xf32>
    %30 = arith.mulf %29, %16 : vector<80x128xf32>
    %cst_15 = arith.constant 0.000000e+00 : f32
    %31 = vector.broadcast %cst_15 : f32 to vector<80x128xf32>
    %32 = arith.subf %31, %10 : vector<80x128xf32>
    %33 = arith.mulf %32, %10 : vector<80x128xf32>
    %34 = math.exp %33 : vector<80x128xf32>
    %35 = arith.mulf %30, %34 : vector<80x128xf32>
    %cst_16 = arith.constant 1.000000e+00 : f32
    %36 = vector.broadcast %cst_16 : f32 to vector<80x128xf32>
    %37 = arith.subf %36, %35 : vector<80x128xf32>
    %cst_17 = arith.constant 0.000000e+00 : f32
    %38 = vector.broadcast %cst_17 : f32 to vector<80x128xf32>
    %39 = arith.cmpf oge, %9, %38 : vector<80x128xf32>
    %cst_18 = arith.constant 0.000000e+00 : f32
    %40 = vector.broadcast %cst_18 : f32 to vector<80x128xf32>
    %41 = arith.subf %40, %37 : vector<80x128xf32>
    %42 = arith.select %39, %37, %41 : vector<80x128xi1>, vector<80x128xf32>
    %cst_19 = arith.constant 1.000000e+00 : f32
    %43 = vector.broadcast %cst_19 : f32 to vector<80x128xf32>
    %44 = arith.addf %43, %42 : vector<80x128xf32>
    %45 = arith.mulf %7, %44 : vector<80x128xf32>
    %46 = arith.truncf %45 : vector<80x128xf32> to vector<80x128xbf16>
    %c0_20 = arith.constant 0 : index
    %c0_21 = arith.constant 0 : index
    %47 = vector.load %arg4[%c0_20, %c0_21] : memref<128x128xbf16, #tpu.memory_space<vmem>>, vector<128x128xbf16>
    %cst_22 = arith.constant dense<0.000000e+00> : vector<80x128xf32>
    %48 = tpu.matmul %46, %47, %cst_22 {dimension_numbers = #tpu.dot_dimension_numbers<[1], [0], [0], [1], [0, 0, 1, 1], [], []>} : vector<80x128xbf16>, vector<128x128xbf16>, vector<80x128xf32> -> vector<80x128xf32>
    %c0_23 = arith.constant 0 : index
    %c0_24 = arith.constant 0 : index
    %49 = vector.load %arg5[%c0_23, %c0_24] : memref<1x128xf32, #tpu.memory_space<vmem>>, vector<1x128xf32>
    %50 = vector.broadcast %49 : vector<1x128xf32> to vector<80x128xf32>
    %51 = arith.addf %48, %50 : vector<80x128xf32>
    %c0_25 = arith.constant 0 : index
    %c0_26 = arith.constant 0 : index
    %52 = vector.load %arg6[%c0_25, %c0_26] : memref<80x128xf32, #tpu.memory_space<vmem>>, vector<80x128xf32>
    tpu.vector_store %arg6[%c0_25, %c0_26], %51 {strides = array<i32>} : memref<80x128xf32, #tpu.memory_space<vmem>>, vector<80x128xf32>,
    return
  }
  func.func @transform_0(%arg0: i32) -> (i32, i32) {
    %c0_i32 = arith.constant 0 : i32
    %c0_i32_0 = arith.constant 0 : i32
    return %arg0, %c0_i32 : i32, i32
  }
  func.func @transform_1(%arg0: i32) -> (i32, i32) {
    %c0_i32 = arith.constant 0 : i32
    %c0_i32_0 = arith.constant 0 : i32
    %c0_i32_1 = arith.constant 0 : i32
    return %c0_i32, %c0_i32_0 : i32, i32
  }
  func.func @transform_2(%arg0: i32) -> (i32, i32) {
    %c0_i32 = arith.constant 0 : i32
    %c0_i32_0 = arith.constant 0 : i32
    %c0_i32_1 = arith.constant 0 : i32
    return %c0_i32, %c0_i32_0 : i32, i32
  }
  func.func @transform_3(%arg0: i32) -> (i32, i32) {
    %c0_i32 = arith.constant 0 : i32
    %c0_i32_0 = arith.constant 0 : i32
    %c0_i32_1 = arith.constant 0 : i32
    return %c0_i32, %c0_i32_0 : i32, i32
  }
  func.func @transform_4(%arg0: i32) -> (i32, i32) {
    %c0_i32 = arith.constant 0 : i32
    %c0_i32_0 = arith.constant 0 : i32
    %c0_i32_1 = arith.constant 0 : i32
    return %c0_i32, %c0_i32_0 : i32, i32
  }
  func.func @transform_5(%arg0: i32) -> (i32, i32) {
    %c0_i32 = arith.constant 0 : i32
    %c0_i32_0 = arith.constant 0 : i32
    return %arg0, %c0_i32 : i32, i32
  }
}

</mosaic_0001>

<bundles_post_ra>
// kernel: trigger_mechanism_forward.17
= control target key start
LH: loop header
LB: loop body
LE: loop exit
PB: predicated region body
PF: predicated region fallthrough
CT: control target
= control target key end

     0   :  { %vm65_vm0 = vcmask 523264   ;;  %s210_s1 = inlined_call_operand.vmem [shape: bf16[64,128], index: 1, kind: input, shape index: {}]   ;;  %s211_s0 = inlined_call_operand.vmem [shape: bf16[24,64], index: 0, kind: input, shape index: {}]   ;;  %s212_s2 = inlined_call_operand.vmem [shape: f32[1,128], index: 2, kind: input, shape index: {}]   ;;  %s213_s3 = inlined_call_operand.vmem [shape: f32[24,128], index: 3, kind: output, shape index: {}]  }
   0x1   :  { %v154_v0 = vld [vmem:[%s210_s1] sm:$0xff]   ;;  %v155_v1 = vld [vmem:[%s210_s1 + $0x8] sm:$0xff]   ;;  %v156_v2 = vld [vmem:[%s210_s1 + $0x10] sm:$0xff]  }
   0x2   :  { %142 = vmatprep.subr.bf16.mxu0 %v154_v0  ;;  %v158_v3 = vld [vmem:[%s211_s0] sm:$0xff]   ;;  %v157_v4 = vld [vmem:[%s210_s1 + $0x18] sm:$0xff]   ;;  %v159_v5 = vld [vmem:[%s211_s0 + $0x8] ss:$0 sps:$4 sm:$0xff]  }
   0x3   :  { %143 = vmatpush3.bf16.msra.mxu0 %v154_v0  ;;  %150 = vmatprep.mubr.msk.bf16.mxu0 %vm65_vm0, %v158_v3  ;;  %v127_v6 = vld [vmem:[%s212_s2] ss:$0 sm:$0xff] }
   0x4   :  { %144 = vmatprep.subr.bf16.mxu0 %v155_v1 }
   0x7   :  { %145 = vmatpush3.bf16.msra.mxu0 %v155_v1 }
   0x8   :  { %146 = vmatprep.subr.bf16.mxu0 %v156_v2 }
   0xb   :  { %147 = vmatpush3.bf16.msra.mxu0 %v156_v2 }
   0xc   :  { %148 = vmatprep.subr.bf16.mxu0 %v157_v4 }
   0xf   :  { %149 = vmatpush3.bf16.msra.mxu0 %v157_v4 }
  0x12   :  { %151 = vmatmul.mubr.msk.bf16.vlgmr.msra.gmra.mrb[0].mxu0 %vm65_vm0, %v159_v5 }
  0xe5   :  { %v152_v7 = vpop.f32.mrb[0].mxu0 }
  0xe6   :  { %v115_v8 = vadd.f32 %v152_v7, %v127_v6  ;;  %v106_v9 = vpop.f32.mrb[1].mxu0 }
  0xe7   :  { %v107_v10 = vadd.f32 %v127_v6, %v106_v9  ;;  %v153_v11 = vpop.f32.mrb[2].mxu0 }
  0xe8   :  { %122 = vst [vmem:[%s213_s3 + $0x10] sm:$0xff] %v115_v8  ;;  %v109_v12 = vpop.f32.mrb[3].mxu0 }
  0xe9   :  { %120 = vst [vmem:[%s213_s3] sm:$0xff] %v107_v10  ;;  %v110_v13 = vadd.f32 %v127_v6, %v109_v12 }
  0xeb   :  { %121 = vst [vmem:[%s213_s3 + $0x8] sm:$0xff] %v110_v13 }

// kernel: trigger_mechanism_forward.11
= control target key start
LH: loop header
LB: loop body
LE: loop exit
PB: predicated region body
PF: predicated region fallthrough
CT: control target
= control target key end

     0   :  { %v263_v0 = vmov 0.0   ;;  %vm264_vm0 = vmmov 0   ;;  %vm89_vm1 = vcmask 523264   ;;  %s350_s1 = inlined_call_operand.vmem [shape: bf16[64,128], index: 1, kind: input, shape index: {}]   ;;  %s351_s0 = inlined_call_operand.vmem [shape: bf16[80,64], index: 0, kind: input, shape index: {}]   ;;  %s352_s2 = inlined_call_operand.vmem [shape: f32[1,128], index: 2, kind: input, shape index: {}]   ;;  %s353_s3 = inlined_call_operand.vmem [shape: f32[80,128], index: 3, kind: output, shape index: {}]  }
   0x1   :  { %216 = vmatprep.subr.bf16.mxu0 %v263_v0  ;;  %v254_v1 = vld [vmem:[%s350_s1] sm:$0xff]   ;;  %244 = vmatprep.subr.bf16.mxu1 %v263_v0  ;;  %v255_v2 = vld [vmem:[%s350_s1 + $0x8] sm:$0xff]   ;;  %v256_v3 = vld [vmem:[%s350_s1 + $0x10] sm:$0xff]  }
   0x2   :  { %224 = vmatprep.mubr.msk.bf16.mxu0 %vm264_vm0, %v263_v0  ;;  %236 = vmatprep.mubr.msk.bf16.mxu1 %vm264_vm0, %v263_v0  ;;  %v257_v4 = vld [vmem:[%s350_s1 + $0x18] sm:$0xff]   ;;  %v258_v5 = vld [vmem:[%s351_s0] sm:$0xff]   ;;  %v260_v7 = vld [vmem:[%s351_s0 + $0x8] sm:$0xff]  }
   0x3   :  { %217 = vmatpush3.bf16.msra.mxu0 %v254_v1  ;;  %248 = vmatpush3.bf16.msra.mxu1 %v254_v1  ;;  %v259_v6 = vld [vmem:[%s351_s0 + $0x18] sm:$0xff]   ;;  %v261_v8 = vld [vmem:[%s351_s0 + $0x20] sm:$0xff]   ;;  %v262_v9 = vld [vmem:[%s351_s0 + $0x10] sm:$0xff]  }
   0x4   :  { %218 = vmatprep.subr.bf16.mxu0 %v263_v0  ;;  %245 = vmatprep.subr.bf16.mxu1 %v263_v0  ;;  %v192_v10 = vld [vmem:[%s352_s2] ss:$0 sm:$0xff] }
   0x7   :  { %219 = vmatpush3.bf16.msra.mxu0 %v255_v2  ;;  %249 = vmatpush3.bf16.msra.mxu1 %v255_v2 }
   0x8   :  { %220 = vmatprep.subr.bf16.mxu0 %v263_v0  ;;  %246 = vmatprep.subr.bf16.mxu1 %v263_v0 }
   0xb   :  { %221 = vmatpush3.bf16.msra.mxu0 %v256_v3  ;;  %250 = vmatpush3.bf16.msra.mxu1 %v256_v3 }
   0xc   :  { %222 = vmatprep.subr.bf16.mxu0 %v263_v0  ;;  %247 = vmatprep.subr.bf16.mxu1 %v263_v0 }
   0xf   :  { %223 = vmatpush3.bf16.msra.mxu0 %v257_v4  ;;  %251 = vmatpush3.bf16.msra.mxu1 %v257_v4 }
  0x12   :  { %225 = vmatmul.mubr.msk.bf16.vlgmr.msra.gmra.mrb[0].mxu0 %vm89_vm1, %v258_v5  ;;  %237 = vmatmul.mubr.msk.bf16.vlgmr.msra.gmra.mrb[0].mxu1 %vm89_vm1, %v259_v6 }
  0x13   :  { %228 = vmatprep.mubr.msk.bf16.mxu0 %vm264_vm0, %v263_v0  ;;  %240 = vmatprep.mubr.msk.bf16.mxu1 %vm264_vm0, %v263_v0 }
  0x1a   :  { %229 = vmatmul.mubr.msk.bf16.gmra.mrb[4].mxu0 %vm89_vm1, %v260_v7  ;;  %241 = vmatmul.mubr.msk.bf16.gmra.mrb[4].mxu1 %vm89_vm1, %v261_v8 }
  0x1b   :  { %232 = vmatprep.mubr.msk.bf16.mxu0 %vm264_vm0, %v263_v0 }
  0x22   :  { %233 = vmatmul.mubr.msk.bf16.gmra.mrb[8].mxu0 %vm89_vm1, %v262_v9 }
  0xe5   :  { %v139_v11 = vpop.f32.mrb[0].mxu0  ;;  %v163_v12 = vpop.f32.mrb[0].mxu1 }
  0xe6   :  { %v140_v13 = vadd.f32 %v192_v10, %v139_v11  ;;  %v226_v14 = vpop.f32.mrb[1].mxu0  ;;  %v164_v15 = vadd.f32 %v192_v10, %v163_v12  ;;  %v238_v16 = vpop.f32.mrb[1].mxu1 }
  0xe7   :  { %v142_v17 = vpop.f32.mrb[2].mxu0  ;;  %v166_v18 = vpop.f32.mrb[2].mxu1 }
  0xe8   :  { %178 = vst [vmem:[%s353_s3] sm:$0xff] %v140_v13  ;;  %v143_v19 = vadd.f32 %v192_v10, %v142_v17  ;;  %v227_v20 = vpop.f32.mrb[3].mxu0  ;;  %184 = vst [vmem:[%s353_s3 + $0x30] sm:$0xff] %v164_v15  ;;  %v167_v21 = vadd.f32 %v192_v10, %v166_v18  ;;  %v239_v22 = vpop.f32.mrb[3].mxu1 }
  0xea   :  { %179 = vst [vmem:[%s353_s3 + $0x8] sm:$0xff] %v143_v19  ;;  %185 = vst [vmem:[%s353_s3 + $0x38] sm:$0xff] %v167_v21 }
  0xed   :  { %v147_v23 = vpop.f32.mrb[4].mxu0  ;;  %v171_v24 = vpop.f32.mrb[4].mxu1 }
  0xee   :  { %v148_v25 = vadd.f32 %v192_v10, %v147_v23  ;;  %v230_v26 = vpop.f32.mrb[5].mxu0  ;;  %v172_v27 = vadd.f32 %v192_v10, %v171_v24  ;;  %v242_v28 = vpop.f32.mrb[5].mxu1 }
  0xef   :  { %v150_v29 = vpop.f32.mrb[6].mxu0  ;;  %v174_v30 = vpop.f32.mrb[6].mxu1 }
  0xf0   :  { %180 = vst [vmem:[%s353_s3 + $0x10] sm:$0xff] %v148_v25  ;;  %v151_v31 = vadd.f32 %v192_v10, %v150_v29  ;;  %v231_v32 = vpop.f32.mrb[7].mxu0  ;;  %186 = vst [vmem:[%s353_s3 + $0x40] sm:$0xff] %v172_v27  ;;  %v175_v33 = vadd.f32 %v192_v10, %v174_v30  ;;  %v243_v34 = vpop.f32.mrb[7].mxu1 }
  0xf2   :  { %181 = vst [vmem:[%s353_s3 + $0x18] sm:$0xff] %v151_v31  ;;  %187 = vst [vmem:[%s353_s3 + $0x48] sm:$0xff] %v175_v33 }
  0xf5   :  { %v155_v35 = vpop.f32.mrb[8].mxu0 }
  0xf6   :  { %v156_v36 = vadd.f32 %v192_v10, %v155_v35  ;;  %v234_v37 = vpop.f32.mrb[9].mxu0 }
  0xf7   :  { %v158_v38 = vpop.f32.mrb[10].mxu0 }
  0xf8   :  { %182 = vst [vmem:[%s353_s3 + $0x20] sm:$0xff] %v156_v36  ;;  %v159_v39 = vadd.f32 %v192_v10, %v158_v38  ;;  %v235_v40 = vpop.f32.mrb[11].mxu0 }
  0xfa   :  { %183 = vst [vmem:[%s353_s3 + $0x28] sm:$0xff] %v159_v39 }

// kernel: trigger_mechanism_forward.13
= control target key start
LH: loop header
LB: loop body
LE: loop exit
PB: predicated region body
PF: predicated region fallthrough
CT: control target
= control target key end

     0   :  { %v277_v1 = vmov 0   ;;  %vm110_vm0 = vcmask 523264   ;;  %v35_v14 = vlaneseq  ;;  %s400_s1 = inlined_call_operand.vmem [shape: bf16[64,256], index: 1, kind: input, shape index: {}]   ;;  %s401_s0 = inlined_call_operand.vmem [shape: bf16[80,64], index: 0, kind: input, shape index: {}]   ;;  %s402_s2 = inlined_call_operand.vmem [shape: f32[1,256], index: 2, kind: input, shape index: {}]   ;;  %s403_s3 = inlined_call_operand.vmem [shape: f32[80,256], index: 3, kind: output, shape index: {}]  }
   0x1   :  { %v260_v0 = vld [vmem:[%s400_s1 + $0x4] ss:$8 sps:$4 sm:$0xff]   ;;  %158 = vmatprep.mubr.bf16.mxu0 %v277_v1  ;;  %188 = vmatprep.mubr.bf16.mxu1 %v277_v1  ;;  %v262_v2 = vld [vmem:[%s400_s1] ss:$8 sps:$4 sm:$0xff]   ;;  %v263_v3 = vld [vmem:[%s400_s1 + $0x14] ss:$8 sps:$4 sm:$0xff]  }
   0x2   :  { %126 = vmatprep.subr.bf16.mxu0 %v260_v0  ;;  %251 = vmatprep.subr.bf16.mxu1 %v260_v0  ;;  %v265_v4 = vld [vmem:[%s400_s1 + $0x10] ss:$8 sps:$4 sm:$0xff]   ;;  %v266_v5 = vld [vmem:[%s400_s1 + $0x24] ss:$8 sps:$4 sm:$0xff]   ;;  %v268_v6 = vld [vmem:[%s400_s1 + $0x20] ss:$8 sps:$4 sm:$0xff]  }
   0x3   :  { %127 = vmatpush1.bf16.msra.mxu0 %v262_v2  ;;  %255 = vmatpush1.bf16.msra.mxu1 %v262_v2  ;;  %v269_v7 = vld [vmem:[%s400_s1 + $0x34] ss:$8 sps:$4 sm:$0xff]   ;;  %v271_v8 = vld [vmem:[%s400_s1 + $0x30] ss:$8 sps:$4 sm:$0xff]   ;;  %v272_v9 = vld [vmem:[%s401_s0] sm:$0xff]   ;;  %v36_v15 = vshrl.u32 %v35_v14, 7 }
   0x4   :  { %128 = vmatprep.subr.bf16.mxu0 %v263_v3  ;;  %252 = vmatprep.subr.bf16.mxu1 %v263_v3  ;;  %v273_v10 = vld [vmem:[%s401_s0 + $0x18] sm:$0xff]   ;;  %v274_v11 = vld [vmem:[%s401_s0 + $0x8] sm:$0xff]   ;;  %v275_v12 = vld [vmem:[%s401_s0 + $0x20] sm:$0xff]  }
   0x5   :  { %v276_v13 = vld [vmem:[%s401_s0 + $0x10] sm:$0xff]   ;;  %v37_v16 = vsub.s32 0, %v36_v15  ;;  %v33_v17 = vld [vmem:[%s402_s2] sm:$0x3]  ;;  %v41_v18 = vsub.s32 1, %v36_v15 }
   0x7   :  { %129 = vmatpush1.bf16.msra.mxu0 %v265_v4  ;;  %256 = vmatpush1.bf16.msra.mxu1 %v265_v4  ;;  %v38_v19 = vrot.slane %v33_v17, %v37_v16  ;;  %v42_v20 = vrot.slane %v33_v17, %v41_v18 }
   0x8   :  { %130 = vmatprep.subr.bf16.mxu0 %v266_v5  ;;  %253 = vmatprep.subr.bf16.mxu1 %v266_v5 }
   0xb   :  { %131 = vmatpush1.bf16.msra.mxu0 %v268_v6  ;;  %257 = vmatpush1.bf16.msra.mxu1 %v268_v6 }
   0xc   :  { %132 = vmatprep.subr.bf16.mxu0 %v269_v7  ;;  %254 = vmatprep.subr.bf16.mxu1 %v269_v7 }
   0xf   :  { %133 = vmatpush1.bf16.msra.mxu0 %v271_v8  ;;  %258 = vmatpush1.bf16.msra.mxu1 %v271_v8 }
  0x12   :  { %246 = vmatmul.mubr.msk.bf16.vlgmr.msra.gmra.mrb[0].mxu0 %vm110_vm0, %v272_v9  ;;  %249 = vmatmul.mubr.msk.bf16.vlgmr.msra.gmra.mrb[0].mxu1 %vm110_vm0, %v273_v10 }
  0x13   :  { %168 = vmatprep.mubr.bf16.mxu0 %v277_v1  ;;  %198 = vmatprep.mubr.bf16.mxu1 %v277_v1 }
  0x1a   :  { %247 = vmatmul.mubr.msk.bf16.gmra.mrb[4].mxu0 %vm110_vm0, %v274_v11  ;;  %250 = vmatmul.mubr.msk.bf16.gmra.mrb[4].mxu1 %vm110_vm0, %v275_v12 }
  0x1b   :  { %178 = vmatprep.mubr.bf16.mxu0 %v277_v1 }
  0x22   :  { %248 = vmatmul.mubr.msk.bf16.gmra.mrb[8].mxu0 %vm110_vm0, %v276_v13 }
  0xe5   :  { %v160_v21 = vpop.f32.mrb[0].mxu0  ;;  %v190_v22 = vpop.f32.mrb[0].mxu1 }
  0xe6   :  { %v161_v23 = vadd.f32 %v160_v21, %v38_v19  ;;  %v162_v24 = vpop.f32.mrb[1].mxu0  ;;  %v191_v25 = vadd.f32 %v190_v22, %v38_v19  ;;  %v192_v26 = vpop.f32.mrb[1].mxu1 }
  0xe7   :  { %v163_v27 = vadd.f32 %v162_v24, %v42_v20  ;;  %v164_v28 = vpop.f32.mrb[2].mxu0  ;;  %v193_v29 = vadd.f32 %v192_v26, %v42_v20  ;;  %v194_v30 = vpop.f32.mrb[2].mxu1 }
  0xe8   :  { %209 = vst [vmem:[%s403_s3] sm:$0xff] %v161_v23  ;;  %v165_v31 = vadd.f32 %v164_v28, %v38_v19  ;;  %v166_v32 = vpop.f32.mrb[3].mxu0  ;;  %221 = vst [vmem:[%s403_s3 + $0x60] sm:$0xff] %v191_v25  ;;  %v195_v33 = vadd.f32 %v194_v30, %v38_v19  ;;  %v196_v34 = vpop.f32.mrb[3].mxu1 }
  0xe9   :  { %210 = vst [vmem:[%s403_s3 + $0x8] sm:$0xff] %v163_v27  ;;  %v167_v35 = vadd.f32 %v166_v32, %v42_v20  ;;  %222 = vst [vmem:[%s403_s3 + $0x68] sm:$0xff] %v193_v29  ;;  %v197_v36 = vadd.f32 %v196_v34, %v42_v20 }
  0xea   :  { %211 = vst [vmem:[%s403_s3 + $0x10] sm:$0xff] %v165_v31  ;;  %223 = vst [vmem:[%s403_s3 + $0x70] sm:$0xff] %v195_v33 }
  0xeb   :  { %212 = vst [vmem:[%s403_s3 + $0x18] sm:$0xff] %v167_v35  ;;  %224 = vst [vmem:[%s403_s3 + $0x78] sm:$0xff] %v197_v36 }
  0xed   :  { %v170_v37 = vpop.f32.mrb[4].mxu0  ;;  %v200_v38 = vpop.f32.mrb[4].mxu1 }
  0xee   :  { %v171_v39 = vadd.f32 %v170_v37, %v38_v19  ;;  %v172_v40 = vpop.f32.mrb[5].mxu0  ;;  %v201_v41 = vadd.f32 %v200_v38, %v38_v19  ;;  %v202_v42 = vpop.f32.mrb[5].mxu1 }
  0xef   :  { %v173_v43 = vadd.f32 %v172_v40, %v42_v20  ;;  %v174_v44 = vpop.f32.mrb[6].mxu0  ;;  %v203_v45 = vadd.f32 %v202_v42, %v42_v20  ;;  %v204_v46 = vpop.f32.mrb[6].mxu1 }
  0xf0   :  { %213 = vst [vmem:[%s403_s3 + $0x20] sm:$0xff] %v171_v39  ;;  %v175_v47 = vadd.f32 %v174_v44, %v38_v19  ;;  %v176_v48 = vpop.f32.mrb[7].mxu0  ;;  %225 = vst [vmem:[%s403_s3 + $0x80] sm:$0xff] %v201_v41  ;;  %v205_v49 = vadd.f32 %v204_v46, %v38_v19  ;;  %v206_v50 = vpop.f32.mrb[7].mxu1 }
  0xf1   :  { %214 = vst [vmem:[%s403_s3 + $0x28] sm:$0xff] %v173_v43  ;;  %v177_v51 = vadd.f32 %v176_v48, %v42_v20  ;;  %226 = vst [vmem:[%s403_s3 + $0x88] sm:$0xff] %v203_v45  ;;  %v207_v52 = vadd.f32 %v206_v50, %v42_v20 }
  0xf2   :  { %215 = vst [vmem:[%s403_s3 + $0x30] sm:$0xff] %v175_v47  ;;  %227 = vst [vmem:[%s403_s3 + $0x90] sm:$0xff] %v205_v49 }
  0xf3   :  { %216 = vst [vmem:[%s403_s3 + $0x38] sm:$0xff] %v177_v51  ;;  %228 = vst [vmem:[%s403_s3 + $0x98] sm:$0xff] %v207_v52 }
  0xf5   :  { %v180_v53 = vpop.f32.mrb[8].mxu0 }
  0xf6   :  { %v181_v54 = vadd.f32 %v180_v53, %v38_v19  ;;  %v182_v55 = vpop.f32.mrb[9].mxu0 }
  0xf7   :  { %v183_v56 = vadd.f32 %v182_v55, %v42_v20  ;;  %v184_v57 = vpop.f32.mrb[10].mxu0 }
  0xf8   :  { %217 = vst [vmem:[%s403_s3 + $0x40] sm:$0xff] %v181_v54  ;;  %v185_v58 = vadd.f32 %v184_v57, %v38_v19  ;;  %v186_v59 = vpop.f32.mrb[11].mxu0 }
  0xf9   :  { %218 = vst [vmem:[%s403_s3 + $0x48] sm:$0xff] %v183_v56  ;;  %v187_v60 = vadd.f32 %v186_v59, %v42_v20 }
  0xfa   :  { %219 = vst [vmem:[%s403_s3 + $0x50] sm:$0xff] %v185_v58 }
  0xfb   :  { %220 = vst [vmem:[%s403_s3 + $0x58] sm:$0xff] %v187_v60 }

// kernel: trigger_mechanism_forward.16
= control target key start
LH: loop header
LB: loop body
LE: loop exit
PB: predicated region body
PF: predicated region fallthrough
CT: control target
= control target key end

     0   :  { %v802_v0 = vmov 0.0   ;;  %vm803_vm0 = vmmov 0   ;;  %vm95_vm1 = vcmask 523264   ;;  %s1129_s1 = inlined_call_operand.vmem [shape: bf16[64,128], index: 1, kind: input, shape index: {}]   ;;  %s1130_s0 = inlined_call_operand.vmem [shape: bf16[80,64], index: 0, kind: input, shape index: {}]   ;;  %s1131_s3 = inlined_call_operand.vmem [shape: bf16[128,128], index: 3, kind: input, shape index: {}]   ;;  %s1132_s2 = inlined_call_operand.vmem [shape: f32[1,128], index: 2, kind: input, shape index: {}]   ;;  %s1133_s4 = inlined_call_operand.vmem [shape: f32[1,128], index: 4, kind: input, shape index: {}]   ;;  %s1134_s5 = inlined_call_operand.vmem [shape: f32[80,128], index: 5, kind: output, shape index: {}]  }
   0x1   :  { %663 = vmatprep.subr.bf16.mxu0 %v802_v0  ;;  %v745_v1 = vld [vmem:[%s1129_s1] sm:$0xff]   ;;  %671 = vmatprep.mubr.msk.bf16.mxu0 %vm803_vm0, %v802_v0  ;;  %v746_v2 = vld [vmem:[%s1129_s1 + $0x8] sm:$0xff]   ;;  %v747_v3 = vld [vmem:[%s1129_s1 + $0x10] sm:$0xff]  }
   0x2   :  { %727 = vmatprep.subr.bf16.mxu1 %v802_v0  ;;  %711 = vmatprep.mubr.msk.bf16.mxu1 %vm803_vm0, %v802_v0  ;;  %v748_v4 = vld [vmem:[%s1129_s1 + $0x18] sm:$0xff]   ;;  %v749_v5 = vld [vmem:[%s1130_s0] sm:$0xff]   ;;  %v750_v6 = vld [vmem:[%s1130_s0 + $0x8] sm:$0xff]  }
   0x3   :  { %664 = vmatpush3.bf16.msra.mxu0 %v745_v1  ;;  %v751_v7 = vld [vmem:[%s1130_s0 + $0x10] sm:$0xff]   ;;  %v752_v8 = vld [vmem:[%s1130_s0 + $0x18] sm:$0xff]   ;;  %v753_v9 = vld [vmem:[%s1130_s0 + $0x20] sm:$0xff]  }
   0x4   :  { %665 = vmatprep.subr.bf16.mxu0 %v802_v0  ;;  %v754_v10 = vld [vmem:[%s1131_s3] sm:$0xff]   ;;  %v755_v11 = vld [vmem:[%s1131_s3 + $0x8] sm:$0xff]   ;;  %v756_v12 = vld [vmem:[%s1131_s3 + $0x10] sm:$0xff]  }
   0x5   :  { %735 = vmatpush3.bf16.msra.mxu1 %v754_v10  ;;  %v757_v13 = vld [vmem:[%s1131_s3 + $0x18] sm:$0xff]   ;;  %v758_v14 = vld [vmem:[%s1131_s3 + $0x20] sm:$0xff]   ;;  %v759_v15 = vld [vmem:[%s1131_s3 + $0x28] sm:$0xff]  }
   0x6   :  { %728 = vmatprep.subr.bf16.mxu1 %v802_v0  ;;  %v760_v16 = vld [vmem:[%s1131_s3 + $0x30] sm:$0xff]   ;;  %v761_v17 = vld [vmem:[%s1131_s3 + $0x38] sm:$0xff]   ;;  %v922_v18 = vld [vmem:[%s1132_s2] ss:$0 sm:$0xff] }
   0x7   :  { %666 = vmatpush3.bf16.msra.mxu0 %v746_v2 }
   0x8   :  { %667 = vmatprep.subr.bf16.mxu0 %v802_v0 }
   0x9   :  { %736 = vmatpush3.bf16.msra.mxu1 %v755_v11 }
   0xa   :  { %729 = vmatprep.subr.bf16.mxu1 %v802_v0 }
   0xb   :  { %668 = vmatpush3.bf16.msra.mxu0 %v747_v3 }
   0xc   :  { %669 = vmatprep.subr.bf16.mxu0 %v802_v0 }
   0xd   :  { %737 = vmatpush3.bf16.msra.mxu1 %v756_v12 }
   0xe   :  { %730 = vmatprep.subr.bf16.mxu1 %v802_v0 }
   0xf   :  { %670 = vmatpush3.bf16.msra.mxu0 %v748_v4 }
  0x10   :  { %691 = vmatprep.subr.bf16.mxu0 %v802_v0 }
  0x11   :  { %738 = vmatpush3.bf16.msra.mxu1 %v757_v13 }
  0x12   :  { %672 = vmatmul.mubr.msk.bf16.vlgmr.msra.gmra.mrb[0].mxu0 %vm95_vm1, %v749_v5  ;;  %731 = vmatprep.subr.bf16.mxu1 %v802_v0 }
  0x13   :  { %675 = vmatprep.mubr.msk.bf16.mxu0 %vm803_vm0, %v802_v0  ;;  %692 = vmatpush3.bf16.msra.mxu0 %v754_v10 }
  0x14   :  { %693 = vmatprep.subr.bf16.mxu0 %v802_v0 }
  0x15   :  { %739 = vmatpush3.bf16.msra.mxu1 %v758_v14 }
  0x16   :  { %732 = vmatprep.subr.bf16.mxu1 %v802_v0 }
  0x17   :  { %694 = vmatpush3.bf16.msra.mxu0 %v755_v11 }
  0x18   :  { %695 = vmatprep.subr.bf16.mxu0 %v802_v0 }
  0x19   :  { %740 = vmatpush3.bf16.msra.mxu1 %v759_v15 }
  0x1a   :  { %676 = vmatmul.mubr.msk.bf16.gmra.mrb[4].mxu0 %vm95_vm1, %v750_v6  ;;  %733 = vmatprep.subr.bf16.mxu1 %v802_v0 }
  0x1b   :  { %679 = vmatprep.mubr.msk.bf16.mxu0 %vm803_vm0, %v802_v0  ;;  %696 = vmatpush3.bf16.msra.mxu0 %v756_v12 }
  0x1c   :  { %697 = vmatprep.subr.bf16.mxu0 %v802_v0 }
  0x1d   :  { %741 = vmatpush3.bf16.msra.mxu1 %v760_v16 }
  0x1e   :  { %734 = vmatprep.subr.bf16.mxu1 %v802_v0 }
  0x1f   :  { %698 = vmatpush3.bf16.msra.mxu0 %v757_v13 }
  0x20   :  { %699 = vmatprep.subr.bf16.mxu0 %v802_v0 }
  0x21   :  { %742 = vmatpush3.bf16.msra.mxu1 %v761_v17 }
  0x22   :  { %680 = vmatmul.mubr.msk.bf16.gmra.mrb[8].mxu0 %vm95_vm1, %v751_v7 }
  0x23   :  { %683 = vmatprep.mubr.msk.bf16.mxu0 %vm803_vm0, %v802_v0  ;;  %700 = vmatpush3.bf16.msra.mxu0 %v758_v14 }
  0x24   :  { %701 = vmatprep.subr.bf16.mxu0 %v802_v0 }
  0x27   :  { %702 = vmatpush3.bf16.msra.mxu0 %v759_v15 }
  0x28   :  { %703 = vmatprep.subr.bf16.mxu0 %v802_v0 }
  0x2a   :  { %684 = vmatmul.mubr.msk.bf16.gmra.mrb[12].mxu0 %vm95_vm1, %v752_v8 }
  0x2b   :  { %687 = vmatprep.mubr.msk.bf16.mxu0 %vm803_vm0, %v802_v0  ;;  %704 = vmatpush3.bf16.msra.mxu0 %v760_v16 }
  0x2c   :  { %705 = vmatprep.subr.bf16.mxu0 %v802_v0 }
  0x2f   :  { %706 = vmatpush3.bf16.msra.mxu0 %v761_v17 }
  0x32   :  { %688 = vmatmul.mubr.msk.bf16.gmra.mrb[16].mxu0 %vm95_vm1, %v753_v9 }
  0x33   :  { %707 = vmatprep.mubr.msk.bf16.mxu0 %vm803_vm0, %v802_v0 }
  0xe5   :  { %v145_v19 = vpop.f32.mrb[0].mxu0 }
  0xe6   :  { %v146_v20 = vadd.f32 %v922_v18, %v145_v19  ;;  %v673_v21 = vpop.f32.mrb[1].mxu0 }
  0xe7   :  { %v148_v22 = vpop.f32.mrb[2].mxu0 }
  0xe8   :  { %v925_v23 = vmul.f32 0.70710677, %v146_v20  ;;  %v149_v24 = vadd.f32 %v922_v18, %v148_v22  ;;  %v674_v25 = vpop.f32.mrb[3].mxu0  ;;  %v964_v4 = vmul.f32 0.5, %v146_v20 }
  0xea   :  { %v204_v26 = vand.u32 2147483647, %v925_v23  ;;  %v929_v27 = vmul.f32 0.70710677, %v149_v24  ;;  %v972_v20 = vmul.f32 0.5, %v149_v24  ;;  %vm404_vm2 = vcmp.ge.f32.partialorder %v925_v23, 0.0 }
  0xec   :  { %v214_v28 = vmul.f32 0.3275911, %v204_v26  ;;  %v205_v29 = vand.u32 2147483647, %v929_v27  ;;  %v344_v41 = vsub.f32 0.0, %v204_v26  ;;  %vm405_vm3 = vcmp.ge.f32.partialorder %v929_v27, 0.0 }
  0xed   :  { %v153_v30 = vpop.f32.mrb[4].mxu0 }
  0xee   :  { %v224_v31 = vadd.f32 1.0, %v214_v28  ;;  %v215_v32 = vmul.f32 0.3275911, %v205_v29  ;;  %v677_v33 = vpop.f32.mrb[5].mxu0  ;;  %v933_v34 = vadd.f32 %v922_v18, %v153_v30  ;;  %v354_v50 = vmul.f32 %v344_v41, %v204_v26 }
  0xef   :  { %v156_v35 = vpop.f32.mrb[6].mxu0  ;;  %v345_v53 = vsub.f32 0.0, %v205_v29 }
  0xf0   :  { %762 = vrcp.f32 %v224_v31  ;;  %v225_v36 = vadd.f32 1.0, %v215_v32  ;;  %v678_v37 = vpop.f32.mrb[7].mxu0  ;;  %v936_v38 = vmul.f32 0.70710677, %v933_v34  ;;  %v939_v39 = vadd.f32 %v922_v18, %v156_v35 }
  0xf1   :  { %v364_v63 = vmul.f32 1.442695, %v354_v50  ;;  %v355_v6 = vmul.f32 %v345_v53, %v205_v29 }
  0xf2   :  { %764 = vrcp.f32 %v225_v36  ;;  %v206_v40 = vand.u32 2147483647, %v936_v38  ;;  %v943_v42 = vmul.f32 0.70710677, %v939_v39  ;;  %v996_v53 = vmul.f32 0.5, %v939_v39 }
  0xf3   :  { %v366_v28 = vmul.f32 1.442695, %v355_v6  ;;  %vm406_vm4 = vcmp.ge.f32.partialorder %v936_v38, 0.0 }
  0xf4   :  { %v216_v43 = vmul.f32 0.3275911, %v206_v40  ;;  %v207_v45 = vand.u32 2147483647, %v943_v42  ;;  %v346_v57 = vsub.f32 0.0, %v206_v40  ;;  %vm407_vm5 = vcmp.ge.f32.partialorder %v943_v42, 0.0 }
  0xf5   :  { %v161_v44 = vpop.f32.mrb[8].mxu0 }
  0xf6   :  { %v947_v46 = vadd.f32 %v922_v18, %v161_v44  ;;  %v681_v47 = vpop.f32.mrb[9].mxu0  ;;  %v226_v48 = vadd.f32 1.0, %v216_v43  ;;  %v217_v51 = vmul.f32 0.3275911, %v207_v45  ;;  %v347_v59 = vsub.f32 0.0, %v207_v45 }
  0xf7   :  { %v164_v49 = vpop.f32.mrb[10].mxu0  ;;  %v356_v10 = vmul.f32 %v346_v57, %v206_v40 }
  0xf8   :  { %v950_v52 = vmul.f32 0.70710677, %v947_v46  ;;  %766 = vrcp.f32 %v226_v48  ;;  %v953_v54 = vadd.f32 %v922_v18, %v164_v49  ;;  %v682_v55 = vpop.f32.mrb[11].mxu0  ;;  %v227_v58 = vadd.f32 1.0, %v217_v51 }
  0xf9   :  { %v357_v11 = vmul.f32 %v347_v59, %v207_v45  ;;  %v368_v31 = vmul.f32 1.442695, %v356_v10 }
  0xfa   :  { %v955_v56 = vpop.eup %762  ;;  %v208_v60 = vand.u32 2147483647, %v950_v52  ;;  %v960_v62 = vmul.f32 0.70710677, %v953_v54  ;;  %768 = vrcp.f32 %v227_v58  ;;  %vm408_vm6 = vcmp.ge.f32.partialorder %v950_v52, 0.0 }
  0xfb   :  { %v254_v61 = vmul.f32 1.0614054, %v955_v56  ;;  %v370_v32 = vmul.f32 1.442695, %v357_v11 }
  0xfc   :  { %v218_v1 = vmul.f32 0.3275911, %v208_v60  ;;  %v348_v2 = vsub.f32 0.0, %v208_v60  ;;  %v962_v3 = vpop.eup %764  ;;  %v209_v7 = vand.u32 2147483647, %v960_v62  ;;  %vm409_vm7 = vcmp.ge.f32.partialorder %v960_v62, 0.0 }
  0xfd   :  { %v264_v5 = vadd.f32 -1.4531521, %v254_v61  ;;  %v169_v8 = vpop.f32.mrb[12].mxu0  ;;  %v255_v9 = vmul.f32 1.0614054, %v962_v3 }
  0xfe   :  { %v228_v12 = vadd.f32 1.0, %v218_v1  ;;  %v685_v13 = vpop.f32.mrb[13].mxu0  ;;  %v358_v15 = vmul.f32 %v348_v2, %v208_v60  ;;  %v219_v16 = vmul.f32 0.3275911, %v209_v7  ;;  %v970_v17 = vadd.f32 %v922_v18, %v169_v8 }
  0xff   :  { %v274_v14 = vmul.f32 %v955_v56, %v264_v5  ;;  %v172_v19 = vpop.f32.mrb[14].mxu0  ;;  %v265_v21 = vadd.f32 -1.4531521, %v255_v9  ;;  %v349_v45 = vsub.f32 0.0, %v209_v7 }
 0x100   :  { %770 = vrcp.f32 %v228_v12  ;;  %v975_v22 = vadd.f32 %v922_v18, %v172_v19  ;;  %v686_v25 = vpop.f32.mrb[15].mxu0  ;;  %v229_v29 = vadd.f32 1.0, %v219_v16  ;;  %v979_v33 = vmul.f32 0.70710677, %v970_v17 }
 0x101   :  { %v284_v26 = vadd.f32 1.4214138, %v274_v14  ;;  %772 = vpow2.f32 %v364_v63  ;;  %v275_v30 = vmul.f32 %v962_v3, %v265_v21  ;;  %v372_v36 = vmul.f32 1.442695, %v358_v15 }
 0x102   :  { %v981_v35 = vpop.eup %766  ;;  %774 = vrcp.f32 %v229_v29  ;;  %v985_v37 = vmul.f32 0.70710677, %v975_v22  ;;  %v210_v43 = vand.u32 2147483647, %v979_v33  ;;  %v359_v39 = vmul.f32 %v349_v45, %v209_v7 }
 0x103   :  { %v294_v24 = vmul.f32 %v955_v56, %v284_v26  ;;  %v285_v40 = vadd.f32 1.4214138, %v275_v30  ;;  %v256_v41 = vmul.f32 1.0614054, %v981_v35  ;;  %776 = vpow2.f32 %v366_v28 }
 0x104   :  { %v211_v47 = vand.u32 2147483647, %v985_v37  ;;  %v992_v49 = vpop.eup %768  ;;  %v220_v55 = vmul.f32 0.3275911, %v210_v43  ;;  %778 = vpow2.f32 %v368_v31  ;;  %v350_v5 = vsub.f32 0.0, %v210_v43 }
 0x105   :  { %v304_v44 = vadd.f32 -0.28449672, %v294_v24  ;;  %v990_v48 = vpop.f32.mrb[16].mxu0  ;;  %v295_v50 = vmul.f32 %v962_v3, %v285_v40  ;;  %v266_v51 = vadd.f32 -1.4531521, %v256_v41  ;;  %vm410_vm8 = vcmp.ge.f32.partialorder %v979_v33, 0.0 }
 0x106   :  { %v689_v57 = vpop.f32.mrb[17].mxu0  ;;  %v257_v59 = vmul.f32 1.0614054, %v992_v49  ;;  %v221_v60 = vmul.f32 0.3275911, %v211_v47  ;;  %v230_v2 = vadd.f32 1.0, %v220_v55  ;;  %v360_v26 = vmul.f32 %v350_v5, %v210_v43 }
 0x107   :  { %v314_v58 = vmul.f32 %v955_v56, %v304_v44  ;;  %v1000_v61 = vpop.f32.mrb[18].mxu0  ;;  %v305_v63 = vadd.f32 -0.28449672, %v295_v50  ;;  %v276_v1 = vmul.f32 %v981_v35, %v266_v51  ;;  %v351_v14 = vsub.f32 0.0, %v211_v47 }
 0x108   :  { %v690_v6 = vpop.f32.mrb[19].mxu0  ;;  %v267_v9 = vadd.f32 -1.4531521, %v257_v59  ;;  %v231_v10 = vadd.f32 1.0, %v221_v60  ;;  %780 = vrcp.f32 %v230_v2  ;;  %v374_v24 = vmul.f32 1.442695, %v359_v39 }
 0x109   :  { %v324_v8 = vadd.f32 0.2548296, %v314_v58  ;;  %v315_v12 = vmul.f32 %v962_v3, %v305_v63  ;;  %v286_v13 = vadd.f32 1.4214138, %v276_v1  ;;  %v361_v43 = vmul.f32 %v351_v14, %v211_v47 }
 0x10a   :  { %v1003_v11 = vpop.eup %770  ;;  %v277_v19 = vmul.f32 %v992_v49, %v267_v9  ;;  %782 = vrcp.f32 %v231_v10  ;;  %v376_v58 = vmul.f32 1.442695, %v360_v26  ;;  %v1022_v5 = vadd.f32 %v922_v18, %v990_v48 }
 0x10b   :  { %v773_v15 = vpop.eup %772  ;;  %v334_v16 = vmul.f32 %v955_v56, %v324_v8  ;;  %v258_v21 = vmul.f32 1.0614054, %v1003_v11  ;;  %v325_v25 = vadd.f32 0.2548296, %v315_v12  ;;  %v296_v7 = vmul.f32 %v981_v35, %v286_v13 }
 0x10c   :  { %784 = vpow2.f32 %v370_v32  ;;  %v1011_v28 = vpop.eup %774  ;;  %v287_v30 = vadd.f32 1.4214138, %v277_v19  ;;  %v378_v9 = vmul.f32 1.442695, %v361_v43  ;;  %v1040_v26 = vmul.f32 0.70710677, %v1022_v5 }
 0x10d   :  { %v384_v29 = vmul.f32 %v773_v15, %v334_v16  ;;  %v268_v31 = vadd.f32 -1.4531521, %v258_v21  ;;  %v335_v56 = vmul.f32 %v962_v3, %v325_v25  ;;  %v306_v40 = vadd.f32 -0.28449672, %v296_v7  ;;  %v777_v44 = vpop.eup %776 }
 0x10e   :  { %786 = vpow2.f32 %v372_v36  ;;  %v259_v41 = vmul.f32 1.0614054, %v1011_v28  ;;  %v297_v50 = vmul.f32 %v992_v49, %v287_v30  ;;  %v779_v59 = vpop.eup %778  ;;  %vm411_vm9 = vcmp.ge.f32.partialorder %v985_v37, 0.0 }
 0x10f   :  { %v394_v45 = vsub.f32 1.0, %v384_v29  ;;  %v278_v32 = vmul.f32 %v1003_v11, %v268_v31  ;;  %v385_v51 = vmul.f32 %v777_v44, %v335_v56  ;;  %v316_v55 = vmul.f32 %v981_v35, %v306_v40 }
 0x110   :  { %v269_v57 = vadd.f32 -1.4531521, %v259_v41  ;;  %v307_v63 = vadd.f32 -0.28449672, %v297_v50  ;;  %788 = vpow2.f32 %v374_v24  ;;  %vm412_vm10 = vcmp.ge.f32.partialorder %v1040_v26, 0.0 }
 0x111   :  { %v414_v60 = vsub.f32 0.0, %v394_v45  ;;  %v288_v3 = vadd.f32 1.4214138, %v278_v32  ;;  %v395_v36 = vsub.f32 1.0, %v385_v51  ;;  %v326_v1 = vadd.f32 0.2548296, %v316_v55 }
 0x112   :  { %v279_v2 = vmul.f32 %v1011_v28, %v269_v57  ;;  %v317_v6 = vmul.f32 %v992_v49, %v307_v63  ;;  %v1029_v39 = vpop.eup %780  ;;  %790 = vpow2.f32 %v376_v58  ;;  %v1050_v55 = vand.u32 2147483647, %v1040_v26  ;;  %v632_v26 = vld [vmem:[%s1133_s4] ss:$0 sm:$0xff] }
 0x113   :  { %v424_v47 = vsel %vm404_vm2, %v394_v45, %v414_v60  ;;  %v298_v8 = vmul.f32 %v1003_v11, %v288_v3  ;;  %v415_v12 = vsub.f32 0.0, %v395_v36  ;;  %v336_v13 = vmul.f32 %v981_v35, %v326_v1 }
 0x114   :  { %v434_v10 = vadd.f32 1.0, %v424_v47  ;;  %v289_v14 = vadd.f32 1.4214138, %v279_v2  ;;  %v1032_v15 = vpop.eup %782  ;;  %v327_v48 = vadd.f32 0.2548296, %v317_v6  ;;  %v1060_v6 = vadd.f32 %v922_v18, %v1000_v61 }
 0x115   :  { %v308_v16 = vadd.f32 -0.28449672, %v298_v8  ;;  %v260_v23 = vmul.f32 1.0614054, %v1029_v39  ;;  %v425_v21 = vsel %vm405_vm3, %v395_v36, %v415_v12  ;;  %v386_v25 = vmul.f32 %v779_v59, %v336_v13 }
 0x116   :  { %v785_v19 = vpop.eup %784  ;;  %v299_v7 = vmul.f32 %v1011_v28, %v289_v14  ;;  %v435_v35 = vadd.f32 1.0, %v425_v21  ;;  %v337_v29 = vmul.f32 %v992_v49, %v327_v48  ;;  %v444_v56 = vmul.f32 %v434_v10, %v964_v4 }
 0x117   :  { %v318_v30 = vmul.f32 %v1003_v11, %v308_v16  ;;  %v270_v31 = vadd.f32 -1.4531521, %v260_v23  ;;  %v396_v40 = vsub.f32 1.0, %v386_v25  ;;  %v261_v41 = vmul.f32 1.0614054, %v1032_v15 }
 0x118   :  { %v787_v24 = vpop.eup %786  ;;  %v309_v27 = vadd.f32 -0.28449672, %v299_v7  ;;  %v445_v44 = vmul.f32 %v435_v35, %v972_v20  ;;  %v387_v45 = vmul.f32 %v785_v19, %v337_v29  ;;  %v222_v36 = vmul.f32 0.3275911, %v1050_v55 }
 0x119   :  { %v328_v50 = vadd.f32 0.2548296, %v318_v30  ;;  %v280_v32 = vmul.f32 %v1029_v39, %v270_v31  ;;  %v416_v43 = vsub.f32 0.0, %v396_v40  ;;  %v271_v49 = vadd.f32 -1.4531521, %v261_v41 }
 0x11a   :  { %v319_v51 = vmul.f32 %v1011_v28, %v309_v27  ;;  %v789_v57 = vpop.eup %788  ;;  %v454_v58 = vpack.c.bf16 %v445_v44, %v444_v56  ;;  %v397_v4 = vsub.f32 1.0, %v387_v45  ;;  %792 = vpow2.f32 %v378_v9 }
 0x11b   :  { %v338_v59 = vmul.f32 %v1003_v11, %v328_v50  ;;  %v290_v60 = vadd.f32 1.4214138, %v280_v32  ;;  %v426_v20 = vsel %vm406_vm4, %v396_v40, %v416_v43  ;;  %v281_v3 = vmul.f32 %v1032_v15, %v271_v49 }
 0x11c   :  { %v329_v63 = vadd.f32 0.2548296, %v319_v51  ;;  %v417_v1 = vsub.f32 0.0, %v397_v4  ;;  %708 = vmatmul.mubr.bf16.vlgmr.msra.gmra.mrb[20].mxu0 %v454_v58  ;;  %v232_v38 = vadd.f32 1.0, %v222_v36  ;;  %v791_v10 = vpop.eup %790  ;;  %v436_v12 = vadd.f32 1.0, %v426_v20 }
 0x11d   :  { %v388_v2 = vmul.f32 %v787_v24, %v338_v59  ;;  %v300_v47 = vmul.f32 %v1029_v39, %v290_v60  ;;  %v291_v8 = vadd.f32 1.4214138, %v281_v3  ;;  %v186_v18 = vmul.f32 0.5, %v933_v34 }
 0x11e   :  { %v339_v11 = vmul.f32 %v1011_v28, %v329_v63  ;;  %v427_v13 = vsel %vm407_vm5, %v397_v4, %v417_v1  ;;  %794 = vrcp.f32 %v232_v38  ;;  %v1069_v9 = vmul.f32 0.70710677, %v1060_v6 }
 0x11f   :  { %v398_v14 = vsub.f32 1.0, %v388_v2  ;;  %v310_v48 = vadd.f32 -0.28449672, %v300_v47  ;;  %v437_v16 = vadd.f32 1.0, %v427_v13  ;;  %v301_v19 = vmul.f32 %v1032_v15, %v291_v8 }
 0x120   :  { %v389_v23 = vmul.f32 %v789_v57, %v339_v11  ;;  %v213_v29 = vand.u32 2147483647, %v1069_v9  ;;  %v446_v30 = vmul.f32 %v436_v12, %v186_v18  ;;  %v188_v31 = vmul.f32 0.5, %v947_v46 }
 0x121   :  { %v418_v61 = vsub.f32 0.0, %v398_v14  ;;  %v320_v28 = vmul.f32 %v1029_v39, %v310_v48  ;;  %v447_v21 = vmul.f32 %v437_v16, %v996_v53  ;;  %v311_v25 = vadd.f32 -0.28449672, %v301_v19 }
 0x122   :  { %v399_v42 = vsub.f32 1.0, %v389_v23  ;;  %v223_v53 = vmul.f32 0.3275911, %v213_v29  ;;  %v352_v41 = vsub.f32 0.0, %v1050_v55  ;;  %v189_v45 = vmul.f32 0.5, %v953_v54 }
 0x123   :  { %v428_v7 = vsel %vm408_vm6, %v398_v14, %v418_v61  ;;  %v330_v35 = vadd.f32 0.2548296, %v320_v28  ;;  %v321_v24 = vmul.f32 %v1032_v15, %v311_v25  ;;  %v455_v44 = vpack.c.bf16 %v447_v21, %v446_v30 }
 0x124   :  { %v419_v34 = vsub.f32 0.0, %v399_v42  ;;  %v438_v56 = vadd.f32 1.0, %v428_v7  ;;  %v233_v43 = vadd.f32 1.0, %v223_v53  ;;  %v793_v46 = vpop.eup %792  ;;  %v362_v4 = vmul.f32 %v352_v41, %v1050_v55 }
 0x125   :  { %v340_v40 = vmul.f32 %v1029_v39, %v330_v35  ;;  %v331_v52 = vadd.f32 0.2548296, %v321_v24  ;;  %712 = vmatmul.mubr.bf16.vlgmr.msra.gmra.mrb[0].mxu1 %v455_v44  ;;  %v353_v47 = vsub.f32 0.0, %v213_v29  ;;  %v190_v8 = vmul.f32 0.5, %v970_v17 }
 0x126   :  { %v429_v27 = vsel %vm409_vm7, %v399_v42, %v419_v34  ;;  %v448_v49 = vmul.f32 %v438_v56, %v188_v31  ;;  %796 = vrcp.f32 %v233_v43  ;;  %715 = vmatprep.mubr.msk.bf16.mxu1 %vm803_vm0, %v802_v0  ;;  %v380_v36 = vmul.f32 1.442695, %v362_v4 }
 0x127   :  { %v439_v50 = vadd.f32 1.0, %v429_v27  ;;  %v390_v32 = vmul.f32 %v791_v10, %v340_v40  ;;  %v341_v51 = vmul.f32 %v1032_v15, %v331_v52  ;;  %v191_v55 = vmul.f32 0.5, %v975_v22 }
 0x128   :  { %v795_v39 = vpop.eup %794  ;;  %798 = vpow2.f32 %v380_v36  ;;  %v363_v48 = vmul.f32 %v353_v47, %v213_v29  ;;  %vm413_vm11 = vcmp.ge.f32.partialorder %v1069_v9, 0.0  ;;  %v192_v44 = vmul.f32 0.5, %v1022_v5 }
 0x129   :  { %v449_v57 = vmul.f32 %v439_v50, %v189_v45  ;;  %v400_v62 = vsub.f32 1.0, %v390_v32  ;;  %v391_v58 = vmul.f32 %v793_v46, %v341_v51  ;;  %v262_v54 = vmul.f32 1.0614054, %v795_v39 }
 0x12a   :  { %v382_v61 = vmul.f32 1.442695, %v363_v48  ;;  %v193_v45 = vmul.f32 0.5, %v1060_v6 }
 0x12b   :  { %v420_v59 = vsub.f32 0.0, %v400_v62  ;;  %v456_v60 = vpack.c.bf16 %v449_v57, %v448_v49  ;;  %v401_v20 = vsub.f32 1.0, %v391_v58  ;;  %v272_v15 = vadd.f32 -1.4531521, %v262_v54 }
 0x12c   :  { %800 = vpow2.f32 %v382_v61 }
 0x12d   :  { %v430_v63 = vsel %vm410_vm8, %v400_v62, %v420_v59  ;;  %v421_v3 = vsub.f32 0.0, %v401_v20  ;;  %v282_v2 = vmul.f32 %v795_v39, %v272_v15  ;;  %716 = vmatmul.mubr.bf16.gmra.mrb[4].mxu1 %v456_v60 }
 0x12e   :  { %v440_v1 = vadd.f32 1.0, %v430_v63  ;;  %719 = vmatprep.mubr.msk.bf16.mxu1 %vm803_vm0, %v802_v0 }
 0x12f   :  { %v431_v11 = vsel %vm411_vm9, %v401_v20, %v421_v3  ;;  %v292_v10 = vadd.f32 1.4214138, %v282_v2 }
 0x130   :  { %v441_v38 = vadd.f32 1.0, %v431_v11  ;;  %v797_v33 = vpop.eup %796  ;;  %v450_v12 = vmul.f32 %v440_v1, %v190_v8 }
 0x131   :  { %v302_v14 = vmul.f32 %v795_v39, %v292_v10  ;;  %v263_v37 = vmul.f32 1.0614054, %v797_v33 }
 0x132   :  { %v451_v13 = vmul.f32 %v441_v38, %v191_v55  ;;  %v799_v42 = vpop.eup %798 }
 0x133   :  { %v312_v16 = vadd.f32 -0.28449672, %v302_v14  ;;  %v273_v19 = vadd.f32 -1.4531521, %v263_v37 }
 0x134   :  { %v457_v23 = vpack.c.bf16 %v451_v13, %v450_v12 }
 0x135   :  { %v322_v18 = vmul.f32 %v795_v39, %v312_v16  ;;  %v283_v17 = vmul.f32 %v797_v33, %v273_v19 }
 0x136   :  { %720 = vmatmul.mubr.bf16.gmra.mrb[8].mxu1 %v457_v23  ;;  %v801_v56 = vpop.eup %800 }
 0x137   :  { %v332_v22 = vadd.f32 0.2548296, %v322_v18  ;;  %723 = vmatprep.mubr.msk.bf16.mxu1 %vm803_vm0, %v802_v0  ;;  %v293_v28 = vadd.f32 1.4214138, %v283_v17 }
 0x139   :  { %v342_v21 = vmul.f32 %v795_v39, %v332_v22  ;;  %v303_v25 = vmul.f32 %v797_v33, %v293_v28 }
 0x13b   :  { %v392_v7 = vmul.f32 %v799_v42, %v342_v21  ;;  %v313_v35 = vadd.f32 -0.28449672, %v303_v25 }
 0x13d   :  { %v402_v29 = vsub.f32 1.0, %v392_v7  ;;  %v323_v30 = vmul.f32 %v797_v33, %v313_v35 }
 0x13f   :  { %v333_v31 = vadd.f32 0.2548296, %v323_v30  ;;  %v422_v34 = vsub.f32 0.0, %v402_v29 }
 0x141   :  { %v343_v24 = vmul.f32 %v797_v33, %v333_v31  ;;  %v432_v53 = vsel %vm412_vm10, %v402_v29, %v422_v34 }
 0x142   :  { %v442_v0 = vadd.f32 1.0, %v432_v53 }
 0x143   :  { %v393_v40 = vmul.f32 %v801_v56, %v343_v24 }
 0x144   :  { %v452_v32 = vmul.f32 %v442_v0, %v192_v44 }
 0x145   :  { %v403_v27 = vsub.f32 1.0, %v393_v40 }
 0x147   :  { %v423_v52 = vsub.f32 0.0, %v403_v27 }
 0x149   :  { %v433_v41 = vsel %vm413_vm11, %v403_v27, %v423_v52 }
 0x14a   :  { %v443_v50 = vadd.f32 1.0, %v433_v41 }
 0x14c   :  { %v453_v43 = vmul.f32 %v443_v50, %v193_v45 }
 0x14e   :  { %v458_v46 = vpack.c.bf16 %v453_v43, %v452_v32 }
 0x150   :  { %724 = vmatmul.mubr.bf16.gmra.mrb[12].mxu1 %v458_v46 }
 0x1ef   :  { %v564_v51 = vpop.f32.mrb[20].mxu0 }
 0x1f0   :  { %v565_v49 = vadd.f32 %v632_v26, %v564_v51  ;;  %v709_v57 = vpop.f32.mrb[21].mxu0 }
 0x1f1   :  { %v567_v62 = vpop.f32.mrb[22].mxu0 }
 0x1f2   :  { %603 = vst [vmem:[%s1134_s5] sm:$0xff] %v565_v49  ;;  %v568_v5 = vadd.f32 %v632_v26, %v567_v62  ;;  %v710_v9 = vpop.f32.mrb[23].mxu0 }
 0x1f4   :  { %604 = vst [vmem:[%s1134_s5 + $0x8] sm:$0xff] %v568_v5 }
 0x1f8   :  { %v572_v6 = vpop.f32.mrb[0].mxu1 }
 0x1f9   :  { %v573_v39 = vadd.f32 %v632_v26, %v572_v6  ;;  %v713_v58 = vpop.f32.mrb[1].mxu1 }
 0x1fa   :  { %v575_v4 = vpop.f32.mrb[2].mxu1 }
 0x1fb   :  { %605 = vst [vmem:[%s1134_s5 + $0x10] sm:$0xff] %v573_v39  ;;  %v576_v59 = vadd.f32 %v632_v26, %v575_v4  ;;  %v714_v54 = vpop.f32.mrb[3].mxu1 }
 0x1fd   :  { %606 = vst [vmem:[%s1134_s5 + $0x18] sm:$0xff] %v576_v59 }
 0x200   :  { %v580_v60 = vpop.f32.mrb[4].mxu1 }
 0x201   :  { %v581_v20 = vadd.f32 %v632_v26, %v580_v60  ;;  %v717_v63 = vpop.f32.mrb[5].mxu1 }
 0x202   :  { %v583_v15 = vpop.f32.mrb[6].mxu1 }
 0x203   :  { %607 = vst [vmem:[%s1134_s5 + $0x20] sm:$0xff] %v581_v20  ;;  %v584_v3 = vadd.f32 %v632_v26, %v583_v15  ;;  %v718_v36 = vpop.f32.mrb[7].mxu1 }
 0x205   :  { %608 = vst [vmem:[%s1134_s5 + $0x28] sm:$0xff] %v584_v3 }
 0x209   :  { %v588_v1 = vpop.f32.mrb[8].mxu1 }
 0x20a   :  { %v589_v2 = vadd.f32 %v632_v26, %v588_v1  ;;  %v721_v47 = vpop.f32.mrb[9].mxu1 }
 0x20b   :  { %v591_v11 = vpop.f32.mrb[10].mxu1 }
 0x20c   :  { %609 = vst [vmem:[%s1134_s5 + $0x30] sm:$0xff] %v589_v2  ;;  %v592_v8 = vadd.f32 %v632_v26, %v591_v11  ;;  %v722_v55 = vpop.f32.mrb[11].mxu1 }
 0x20e   :  { %610 = vst [vmem:[%s1134_s5 + $0x38] sm:$0xff] %v592_v8 }
 0x223   :  { %v596_v38 = vpop.f32.mrb[12].mxu1 }
 0x224   :  { %v597_v10 = vadd.f32 %v632_v26, %v596_v38  ;;  %v725_v33 = vpop.f32.mrb[13].mxu1 }
 0x225   :  { %v599_v12 = vpop.f32.mrb[14].mxu1 }
 0x226   :  { %611 = vst [vmem:[%s1134_s5 + $0x40] sm:$0xff] %v597_v10  ;;  %v600_v13 = vadd.f32 %v632_v26, %v599_v12  ;;  %v726_v14 = vpop.f32.mrb[15].mxu1 }
 0x228   :  { %612 = vst [vmem:[%s1134_s5 + $0x48] sm:$0xff] %v600_v13 }

</bundles_post_ra>
